<compile_context>
chip_gen: v6e
topology: v6e:2x2x1
jax: 0.10.0
libtpu: 0.0.40
codegen_flags: <defaults>
</compile_context>

<pallas_src>
import math

import jax
import jax.numpy as jnp
from jax.experimental import pallas as pl
from jax.experimental.pallas import tpu as pltpu

# Full f32 matmul precision everywhere (kernel + pure-JAX reference) so the
# folded/fused kernel can be checked against the straightforward math.
jax.config.update("jax_default_matmul_precision", "highest")

# ----------------------------- model configuration ---------------------------
FEATURES = ["Month", "Day", "Hour", "Temp", "Humidity", "Wind", "Pressure"]
N_CONT = 4                       # Temp, Humidity, Wind, Pressure
NUM_FEATS = len(FEATURES)        # 7 feature cols + 7 flag cols = 14 input cols
EMB_DIM = 3
H_DIMS = [32, 32]                # hidden MLP ("self.lins")
IN_DIM = N_CONT * 2 + 2 * (EMB_DIM + 1) + 1          # 17, as in the module
HIDDEN = H_DIMS[-1]              # 32
CONT_SIZES = [round(HIDDEN + (N_CONT - HIDDEN) * i / 3) for i in range(3)] + [N_CONT]
# -> [32, 23, 13, 4]
N_MONTH, N_DAY, N_HOUR = 12, 31, 24
N_HEADS = N_MONTH + N_DAY + N_HOUR                   # 67
EMB_LANES = 13 + 13 + 13 + 25                        # 64 weighted one-hot lanes
LANES = 128
BATCH = 8

# --------------------- packed parameter slab layout (static) -----------------
# Weight slab [W_ROWS, 128]; every block starts on a sublane-aligned row and
# occupies lanes [0:out_dim].
OFF_WCONT = 0        # [ 4, 32]  wl0 rows for the continuous features
OFF_WFLAGS = 8       # [ 7, 32]  wl0 rows for the flag features
OFF_WEMB = 16        # [64, 32]  embedding tables folded into wl0 (curr|last|next|hour)
OFF_WL1 = 80         # [32, 32]
OFF_WC0 = 112        # [32, 23]
OFF_WC1 = 144        # [23, 13]
OFF_WC2 = 168        # [13,  4]  de-normalization folded in (wc2 * stds)
OFF_WHEADS = 184     # [32, 67]  month|day|hour classifier weights
W_ROWS = 216

# Bias / scalar slab [B_ROWS, 128], one row per vector.
ROW_MEANS = 0        # [1,  4]
ROW_INVSTD = 1       # [1,  4]   1 / stds
ROW_BL0 = 2          # [1, 32]
ROW_BL1 = 3          # [1, 32]
ROW_BC0 = 4          # [1, 23]
ROW_BC1 = 5          # [1, 13]
ROW_BC2 = 6          # [1,  4]   bc2 * stds + means
ROW_BHEADS = 7       # [1, 67]
B_ROWS = 8

# Single lane-dense output block [B, 128] layout.
OUT_CONT = 0                       # 4 lanes
OUT_MONTH = OUT_CONT + N_CONT      # 4..15
OUT_DAY = OUT_MONTH + N_MONTH      # 16..46
OUT_HOUR = OUT_DAY + N_DAY         # 47..70


# --------------------------------- the kernel --------------------------------
def weather_kernel(x_ref, w_ref, b_ref, out_ref):
    x = x_ref[...]                                         # [TB, 14] f32
    tb = x.shape[0]

    means = b_ref[ROW_MEANS:ROW_MEANS + 1, 0:N_CONT]       # [1, 4]
    inv_std = b_ref[ROW_INVSTD:ROW_INVSTD + 1, 0:N_CONT]   # [1, 4]

    # ------------------------------ normalize() ------------------------------
    flags = x[:, NUM_FEATS:2 * NUM_FEATS]                  # [TB, 7]
    cont_flags = flags[:, 3:]                              # [TB, 4]
    cont = (x[:, 3:3 + N_CONT] - means) * inv_std          # normalize first,
    cont = jnp.where(cont_flags != 0.0, 0.0, cont)         # then cont[flag] = 0

    month_f = x[:, 0:1]
    day_f = jnp.where(x[:, 1:2] == 0.0, 15.0, x[:, 1:2])   # X[day==0, day] = 15
    hour_f = x[:, 2:3]

    month_i = month_f.astype(jnp.int32)
    hour_i = hour_f.astype(jnp.int32)
    last_i = jnp.mod(month_i - 2, 12) + 1
    next_i = jnp.mod(month_i, 12) + 1

    black = month_f == 0.0                                 # [TB, 1]
    c_w = (15.0 - jnp.abs(day_f - 15.0)) / 30.0 + 0.5
    w_curr = jnp.where(black, 1.0, c_w)
    w_close = jnp.where(black, 0.0, 1.0 - c_w)
    close_is_last = day_f < 15.0
    w_last = jnp.where(close_is_last, w_close, 0.0)
    w_next = jnp.where(close_is_last, 0.0, w_close)

    # Weighted one-hot block [TB, 64]: curr(13) | last(13) | next(13) | hour(25).
    # The embedding tables are folded into the layer-0 weights at OFF_WEMB, so
    # one matmul replaces 4 embedding lookups + the lane concatenate.
    lane = jax.lax.broadcasted_iota(jnp.int32, (tb, EMB_LANES), 1)
    onehot = (w_curr * (lane == month_i).astype(jnp.float32)
              + w_last * (lane == 13 + last_i).astype(jnp.float32)
              + w_next * (lane == 26 + next_i).astype(jnp.float32)
              + (lane == 39 + hour_i).astype(jnp.float32))

    # -------------------- hidden MLP (concat-free layer 0) -------------------
    h = (jnp.dot(cont, w_ref[OFF_WCONT:OFF_WCONT + N_CONT, 0:H_DIMS[0]],
                 preferred_element_type=jnp.float32)
         + jnp.dot(flags, w_ref[OFF_WFLAGS:OFF_WFLAGS + NUM_FEATS, 0:H_DIMS[0]],
                   preferred_element_type=jnp.float32)
         + jnp.dot(onehot, w_ref[OFF_WEMB:OFF_WEMB + EMB_LANES, 0:H_DIMS[0]],
                   preferred_element_type=jnp.float32)
         + b_ref[ROW_BL0:ROW_BL0 + 1, 0:H_DIMS[0]])
    h = jnp.maximum(h, 0.0)

    h = jnp.maximum(
        jnp.dot(h, w_ref[OFF_WL1:OFF_WL1 + H_DIMS[0], 0:H_DIMS[1]],
                preferred_element_type=jnp.float32)
        + b_ref[ROW_BL1:ROW_BL1 + 1, 0:H_DIMS[1]], 0.0)

    # -------------- cont_regressor (de-normalization pre-folded) -------------
    c = jnp.maximum(
        jnp.dot(h, w_ref[OFF_WC0:OFF_WC0 + CONT_SIZES[0], 0:CONT_SIZES[1]],
                preferred_element_type=jnp.float32)
        + b_ref[ROW_BC0:ROW_BC0 + 1, 0:CONT_SIZES[1]], 0.0)
    c = jnp.maximum(
        jnp.dot(c, w_ref[OFF_WC1:OFF_WC1 + CONT_SIZES[1], 0:CONT_SIZES[2]],
                preferred_element_type=jnp.float32)
        + b_ref[ROW_BC1:ROW_BC1 + 1, 0:CONT_SIZES[2]], 0.0)
    c = (jnp.dot(c, w_ref[OFF_WC2:OFF_WC2 + CONT_SIZES[2], 0:N_CONT],
                 preferred_element_type=jnp.float32)
         + b_ref[ROW_BC2:ROW_BC2 + 1, 0:N_CONT])           # already de-normalized

    # ------------------ classifier heads: 1 matmul, 3 softmaxes --------------
    s = (jnp.dot(h, w_ref[OFF_WHEADS:OFF_WHEADS + HIDDEN, 0:N_HEADS],
                 preferred_element_type=jnp.float32)
         + b_ref[ROW_BHEADS:ROW_BHEADS + 1, 0:N_HEADS])    # [TB, 67]

    def softmax(z):
        z = z - jnp.max(z, axis=-1, keepdims=True)
        e = jnp.exp(z)
        return e * pl.reciprocal(jnp.sum(e, axis=-1, keepdims=True), approx=False)

    p_month = softmax(s[:, 0:N_MONTH])
    p_day = softmax(s[:, N_MONTH:N_MONTH + N_DAY])
    p_hour = softmax(s[:, N_MONTH + N_DAY:N_HEADS])

    # ----------------- single lane-dense [TB, 128] output block --------------
    out_ref[...] = jnp.zeros_like(out_ref)
    out_ref[:, OUT_CONT:OUT_CONT + N_CONT] = c
    out_ref[:, OUT_MONTH:OUT_MONTH + N_MONTH] = p_month
    out_ref[:, OUT_DAY:OUT_DAY + N_DAY] = p_day
    out_ref[:, OUT_HOUR:OUT_HOUR + N_HOUR] = p_hour


# ---------------------------------- wrapper ----------------------------------
def _round_up(n, m):
    return ((n + m - 1) // m) * m


def weather_forward(x, packed):
    """x: [B, 14] f32 -> (cont[B,4], month[B,12], day[B,31], hour[B,24])."""
    w_slab = packed["w_slab"]
    b_slab = packed["b_slab"]
    batch = x.shape[0]
    tile_b = min(512, _round_up(max(batch, 8), 8))
    padded_b = _round_up(batch, tile_b)
    if padded_b != batch:
        x = jnp.pad(x, ((0, padded_b - batch), (0, 0)))

    out = pl.pallas_call(
        weather_kernel,
        out_shape=jax.ShapeDtypeStruct((padded_b, LANES), jnp.float32),
        grid_spec=pltpu.PrefetchScalarGridSpec(
            num_scalar_prefetch=0,
            grid=(padded_b // tile_b,),
            in_specs=[
                pl.BlockSpec((tile_b, 2 * NUM_FEATS), lambda i: (i, 0)),
                pl.BlockSpec((W_ROWS, LANES), lambda i: (0, 0)),   # resident weights
                pl.BlockSpec((B_ROWS, LANES), lambda i: (0, 0)),   # resident biases
            ],
            out_specs=pl.BlockSpec((tile_b, LANES), lambda i: (i, 0)),
        ),
        compiler_params=pltpu.CompilerParams(
            dimension_semantics=("parallel",)),        # 2-TC sharding on v7x
    )(x, w_slab, b_slab)

    cont = out[:batch, OUT_CONT:OUT_CONT + N_CONT]
    month = out[:batch, OUT_MONTH:OUT_MONTH + N_MONTH]
    day = out[:batch, OUT_DAY:OUT_DAY + N_DAY]
    hour = out[:batch, OUT_HOUR:OUT_HOUR + N_HOUR]
    return cont, month, day, hour


# ---------------------------- deterministic init ------------------------------
def init_linear(key, fan_in, fan_out):
    """nn.Linear-style init, weight already transposed to [in, out]."""
    kw, kb = jax.random.split(key)
    bound = 1.0 / math.sqrt(fan_in)
    w = jax.random.uniform(kw, (fan_in, fan_out), jnp.float32, -bound, bound)
    b = jax.random.uniform(kb, (1, fan_out), jnp.float32, -bound, bound)
    return w, b


def init_params(key):
    keys = jax.random.split(key, 12)
    p = {}
    p["m_emb"] = jax.random.normal(keys[0], (13, EMB_DIM), jnp.float32)
    p["h_emb"] = jax.random.normal(keys[1], (25, EMB_DIM), jnp.float32)
    p["means"] = jnp.zeros((1, N_CONT), jnp.float32)   # as in __init__
    p["stds"] = jnp.ones((1, N_CONT), jnp.float32)     # as in __init__
    # self.lins: [IN_DIM] + H_DIMS, input order [cont(4), month_emb(3), hour_emb(3), flags(7)]
    p["wl0"], p["bl0"] = init_linear(keys[2], IN_DIM, H_DIMS[0])
    p["wl1"], p["bl1"] = init_linear(keys[3], H_DIMS[0], H_DIMS[1])
    # cont_regressor: CONT_SIZES = [32, 23, 13, 4]
    p["wc0"], p["bc0"] = init_linear(keys[4], CONT_SIZES[0], CONT_SIZES[1])
    p["wc1"], p["bc1"] = init_linear(keys[5], CONT_SIZES[1], CONT_SIZES[2])
    p["wc2"], p["bc2"] = init_linear(keys[6], CONT_SIZES[2], CONT_SIZES[3])
    # classifier heads (depth=1 => single linear + softmax)
    p["wm"], p["bm"] = init_linear(keys[7], HIDDEN, N_MONTH)
    p["wd"], p["bd"] = init_linear(keys[8], HIDDEN, N_DAY)
    p["wh"], p["bh"] = init_linear(keys[9], HIDDEN, N_HOUR)
    return p


def pack_params(p):
    """Fold + pack the raw parameters into two lane-dense f32 slabs."""
    wl0 = p["wl0"]                                         # [17, 32]
    w_cont, w_month, w_hour, w_flags = wl0[0:4], wl0[4:7], wl0[7:10], wl0[10:17]
    m_fold = jnp.dot(p["m_emb"], w_month)                  # [13, 32] emb folded into layer 0
    h_fold = jnp.dot(p["h_emb"], w_hour)                   # [25, 32]
    wc2_fold = p["wc2"] * p["stds"]                        # de_normalize folded (column scale)
    bc2_fold = p["bc2"] * p["stds"] + p["means"]
    w_heads = jnp.concatenate([p["wm"], p["wd"], p["wh"]], axis=1)   # [32, 67]
    b_heads = jnp.concatenate([p["bm"], p["bd"], p["bh"]], axis=1)   # [1, 67]

    def put(slab, row, block):
        r, c = block.shape
        return slab.at[row:row + r, 0:c].set(block)

    w = jnp.zeros((W_ROWS, LANES), jnp.float32)
    w = put(w, OFF_WCONT, w_cont)
    w = put(w, OFF_WFLAGS, w_flags)
    w = put(w, OFF_WEMB, m_fold)              # curr month
    w = put(w, OFF_WEMB + 13, m_fold)         # last month
    w = put(w, OFF_WEMB + 26, m_fold)         # next month
    w = put(w, OFF_WEMB + 39, h_fold)         # hour
    w = put(w, OFF_WL1, p["wl1"])
    w = put(w, OFF_WC0, p["wc0"])
    w = put(w, OFF_WC1, p["wc1"])
    w = put(w, OFF_WC2, wc2_fold)
    w = put(w, OFF_WHEADS, w_heads)

    b = jnp.zeros((B_ROWS, LANES), jnp.float32)
    b = put(b, ROW_MEANS, p["means"])
    b = put(b, ROW_INVSTD, 1.0 / p["stds"])
    b = put(b, ROW_BL0, p["bl0"])
    b = put(b, ROW_BL1, p["bl1"])
    b = put(b, ROW_BC0, p["bc0"])
    b = put(b, ROW_BC1, p["bc1"])
    b = put(b, ROW_BC2, bc2_fold)
    b = put(b, ROW_BHEADS, b_heads)
    return {"w_slab": w, "b_slab": b}


def make_input(key, batch):
    km, kd, kh, kc, kf = jax.random.split(key, 5)
    months = jax.random.randint(km, (batch, 1), 0, 13).astype(jnp.float32)
    days = jax.random.randint(kd, (batch, 1), 0, 32).astype(jnp.float32)
    hours = jax.random.randint(kh, (batch, 1), 0, 25).astype(jnp.float32)
    cont = jax.random.normal(kc, (batch, N_CONT), jnp.float32)
    flags = jax.random.randint(kf, (batch, NUM_FEATS), 0, 2).astype(jnp.float32)
    return jnp.concatenate([months, days, hours, cont, flags], axis=-1)  # [B, 14]


def weather_reference(x, p):
    """Straight (un-folded, un-fused) JAX port of WeatherModel.forward."""
    flags = x[:, NUM_FEATS:]
    cont_flags = flags[:, 3:]
    cont = (x[:, 3:3 + N_CONT] - p["means"]) / p["stds"]
    cont = jnp.where(cont_flags != 0.0, 0.0, cont)
    month = x[:, 0]
    day = jnp.where(x[:, 1] == 0.0, 15.0, x[:, 1])
    hour = x[:, 2]
    m_i = month.astype(jnp.int32)
    curr = p["m_emb"][m_i]
    last = p["m_emb"][jnp.mod(m_i - 2, 12) + 1]
    nxt = p["m_emb"][jnp.mod(m_i, 12) + 1]
    hrs = p["h_emb"][hour.astype(jnp.int32)]
    black = (month == 0.0)[:, None]
    close = jnp.where((day < 15.0)[:, None], last, nxt)
    c_w = ((15.0 - jnp.abs(day - 15.0)) / 30.0 + 0.5)[:, None]
    months_emb = jnp.where(black, curr, curr * c_w + close * (1.0 - c_w))
    h = jnp.concatenate([cont, months_emb, hrs, flags], axis=-1)
    h = jax.nn.relu(h @ p["wl0"] + p["bl0"])
    h = jax.nn.relu(h @ p["wl1"] + p["bl1"])
    c = jax.nn.relu(h @ p["wc0"] + p["bc0"])
    c = jax.nn.relu(c @ p["wc1"] + p["bc1"])
    c = c @ p["wc2"] + p["bc2"]
    c = c * p["stds"] + p["means"]
    p_m = jax.nn.softmax(h @ p["wm"] + p["bm"], axis=-1)
    p_d = jax.nn.softmax(h @ p["wd"] + p["bd"], axis=-1)
    p_h = jax.nn.softmax(h @ p["wh"] + p["bh"], axis=-1)
    return c, p_m, p_d, p_h


if __name__ == "__main__":
    root = jax.random.PRNGKey(0)
    k_params, k_input = jax.random.split(root)
    raw = init_params(k_params)
    packed = pack_params(raw)
    x = make_input(k_input, BATCH)

    cont, month, day, hour = weather_forward(x, packed)
    jax.block_until_ready((cont, month, day, hour))

    assert cont.shape == (BATCH, N_CONT)
    assert month.shape == (BATCH, N_MONTH)
    assert day.shape == (BATCH, N_DAY)
    assert hour.shape == (BATCH, N_HOUR)
    # softmax heads should sum to ~1 per row
    assert bool(jnp.allclose(jnp.sum(month, axis=-1), 1.0, atol=1e-4))
    assert bool(jnp.allclose(jnp.sum(day, axis=-1), 1.0, atol=1e-4))
    assert bool(jnp.allclose(jnp.sum(hour, axis=-1), 1.0, atol=1e-4))

    # Fused/folded kernel must match the straightforward math on the raw params.
    r_cont, r_month, r_day, r_hour = weather_reference(x, raw)
    for got, ref in ((cont, r_cont), (month, r_month), (day, r_day), (hour, r_hour)):
        assert bool(jnp.allclose(got, ref, rtol=1e-2, atol=1e-2))

    print("KERNEL_OK")
</pallas_src>

<mosaic_0001>
module attributes {stable_mosaic.version = 11 : i64} {
  func.func @weather_kernel(%arg0: i32, %arg1: memref<8x14xf32, #tpu.memory_space<vmem>>, %arg2: memref<216x128xf32, #tpu.memory_space<vmem>>, %arg3: memref<8x128xf32, #tpu.memory_space<vmem>>, %arg4: memref<8x128xf32, #tpu.memory_space<vmem>>) attributes {dimension_semantics = [#tpu.dimension_semantics<parallel>], iteration_bounds = array<i64: 1>, scalar_prefetch = 0 : i64, scratch_operands = 0 : i64, tpu.core_type = #tpu.core_type<tc>, window_params = [{transform_indices = @transform_0, window_bounds = array<i64: 8, 14>}, {pipeline_mode = #tpu.pipeline_mode<synchronous>, transform_indices = @transform_1, window_bounds = array<i64: 216, 128>}, {pipeline_mode = #tpu.pipeline_mode<synchronous>, transform_indices = @transform_2, window_bounds = array<i64: 8, 128>}, {transform_indices = @transform_3, window_bounds = array<i64: 8, 128>}]} {
    %c0 = arith.constant 0 : index
    %c0_0 = arith.constant 0 : index
    %0 = vector.load %arg1[%c0, %c0_0] : memref<8x14xf32, #tpu.memory_space<vmem>>, vector<8x14xf32>
    %c0_1 = arith.constant 0 : index
    %c0_2 = arith.constant 0 : index
    %1 = vector.load %arg3[%c0_1, %c0_2] : memref<8x128xf32, #tpu.memory_space<vmem>>, vector<1x4xf32>
    %c1 = arith.constant 1 : index
    %c0_3 = arith.constant 0 : index
    %2 = vector.load %arg3[%c1, %c0_3] : memref<8x128xf32, #tpu.memory_space<vmem>>, vector<1x4xf32>
    %3 = vector.extract_strided_slice %0 {offsets = [0, 7], sizes = [8, 7], strides = [1, 1]} : vector<8x14xf32> to vector<8x7xf32>
    %4 = vector.extract_strided_slice %3 {offsets = [0, 3], sizes = [8, 4], strides = [1, 1]} : vector<8x7xf32> to vector<8x4xf32>
    %5 = vector.extract_strided_slice %0 {offsets = [0, 3], sizes = [8, 4], strides = [1, 1]} : vector<8x14xf32> to vector<8x4xf32>
    %6 = vector.broadcast %1 : vector<1x4xf32> to vector<8x4xf32>
    %7 = arith.subf %5, %6 : vector<8x4xf32>
    %8 = vector.broadcast %2 : vector<1x4xf32> to vector<8x4xf32>
    %9 = arith.mulf %7, %8 : vector<8x4xf32>
    %cst = arith.constant 0.000000e+00 : f32
    %10 = vector.broadcast %cst : f32 to vector<8x4xf32>
    %11 = arith.cmpf one, %4, %10 : vector<8x4xf32>
    %cst_4 = arith.constant 0.000000e+00 : f32
    %12 = vector.broadcast %cst_4 : f32 to vector<8x4xf32>
    %13 = arith.select %11, %12, %9 : vector<8x4xi1>, vector<8x4xf32>
    %14 = vector.extract_strided_slice %0 {offsets = [0, 0], sizes = [8, 1], strides = [1, 1]} : vector<8x14xf32> to vector<8x1xf32>
    %15 = vector.extract_strided_slice %0 {offsets = [0, 1], sizes = [8, 1], strides = [1, 1]} : vector<8x14xf32> to vector<8x1xf32>
    %cst_5 = arith.constant 0.000000e+00 : f32
    %16 = vector.broadcast %cst_5 : f32 to vector<8x1xf32>
    %17 = arith.cmpf oeq, %15, %16 : vector<8x1xf32>
    %18 = vector.extract_strided_slice %0 {offsets = [0, 1], sizes = [8, 1], strides = [1, 1]} : vector<8x14xf32> to vector<8x1xf32>
    %cst_6 = arith.constant 1.500000e+01 : f32
    %19 = vector.broadcast %cst_6 : f32 to vector<8x1xf32>
    %20 = arith.select %17, %19, %18 : vector<8x1xi1>, vector<8x1xf32>
    %21 = vector.extract_strided_slice %0 {offsets = [0, 2], sizes = [8, 1], strides = [1, 1]} : vector<8x14xf32> to vector<8x1xf32>
    %22 = arith.fptosi %14 : vector<8x1xf32> to vector<8x1xi32>
    %23 = arith.fptosi %21 : vector<8x1xf32> to vector<8x1xi32>
    %c2_i32 = arith.constant 2 : i32
    %24 = vector.broadcast %c2_i32 : i32 to vector<8x1xi32>
    %25 = arith.subi %22, %24 : vector<8x1xi32>
    %c12_i32 = arith.constant 12 : i32
    %c0_i32 = arith.constant 0 : i32
    %26 = arith.cmpi eq, %c12_i32, %c0_i32 : i32
    %c1_i32 = arith.constant 1 : i32
    %27 = arith.select %26, %c1_i32, %c12_i32 : i32
    %28 = vector.broadcast %27 : i32 to vector<8x1xi32>
    %29 = arith.remsi %25, %28 : vector<8x1xi32>
    %c0_i32_7 = arith.constant 0 : i32
    %30 = vector.broadcast %c0_i32_7 : i32 to vector<8x1xi32>
    %31 = arith.cmpi ne, %29, %30 : vector<8x1xi32>
    %c0_i32_8 = arith.constant 0 : i32
    %32 = vector.broadcast %c0_i32_8 : i32 to vector<8x1xi32>
    %33 = arith.cmpi slt, %29, %32 : vector<8x1xi32>
    %c0_i32_9 = arith.constant 0 : i32
    %34 = arith.cmpi slt, %27, %c0_i32_9 : i32
    %35 = vector.broadcast %34 : i1 to vector<8x1xi1>
    %36 = vector.broadcast %35 : vector<8x1xi1> to vector<8x1xi1>
    %37 = arith.xori %33, %36 : vector<8x1xi1>
    %38 = arith.andi %37, %31 : vector<8x1xi1>
    %39 = vector.broadcast %27 : i32 to vector<8x1xi32>
    %40 = arith.addi %29, %39 : vector<8x1xi32>
    %41 = arith.select %38, %40, %29 : vector<8x1xi1>, vector<8x1xi32>
    %c1_i32_10 = arith.constant 1 : i32
    %42 = vector.broadcast %c1_i32_10 : i32 to vector<8x1xi32>
    %43 = arith.addi %41, %42 : vector<8x1xi32>
    %c12_i32_11 = arith.constant 12 : i32
    %c0_i32_12 = arith.constant 0 : i32
    %44 = arith.cmpi eq, %c12_i32_11, %c0_i32_12 : i32
    %c1_i32_13 = arith.constant 1 : i32
    %45 = arith.select %44, %c1_i32_13, %c12_i32_11 : i32
    %46 = vector.broadcast %45 : i32 to vector<8x1xi32>
    %47 = arith.remsi %22, %46 : vector<8x1xi32>
    %c0_i32_14 = arith.constant 0 : i32
    %48 = vector.broadcast %c0_i32_14 : i32 to vector<8x1xi32>
    %49 = arith.cmpi ne, %47, %48 : vector<8x1xi32>
    %c0_i32_15 = arith.constant 0 : i32
    %50 = vector.broadcast %c0_i32_15 : i32 to vector<8x1xi32>
    %51 = arith.cmpi slt, %47, %50 : vector<8x1xi32>
    %c0_i32_16 = arith.constant 0 : i32
    %52 = arith.cmpi slt, %45, %c0_i32_16 : i32
    %53 = vector.broadcast %52 : i1 to vector<8x1xi1>
    %54 = vector.broadcast %53 : vector<8x1xi1> to vector<8x1xi1>
    %55 = arith.xori %51, %54 : vector<8x1xi1>
    %56 = arith.andi %55, %49 : vector<8x1xi1>
    %57 = vector.broadcast %45 : i32 to vector<8x1xi32>
    %58 = arith.addi %47, %57 : vector<8x1xi32>
    %59 = arith.select %56, %58, %47 : vector<8x1xi1>, vector<8x1xi32>
    %c1_i32_17 = arith.constant 1 : i32
    %60 = vector.broadcast %c1_i32_17 : i32 to vector<8x1xi32>
    %61 = arith.addi %59, %60 : vector<8x1xi32>
    %cst_18 = arith.constant 0.000000e+00 : f32
    %62 = vector.broadcast %cst_18 : f32 to vector<8x1xf32>
    %63 = arith.cmpf oeq, %14, %62 : vector<8x1xf32>
    %cst_19 = arith.constant 1.500000e+01 : f32
    %64 = vector.broadcast %cst_19 : f32 to vector<8x1xf32>
    %65 = arith.subf %20, %64 : vector<8x1xf32>
    %66 = math.absf %65 : vector<8x1xf32>
    %cst_20 = arith.constant 1.500000e+01 : f32
    %67 = vector.broadcast %cst_20 : f32 to vector<8x1xf32>
    %68 = arith.subf %67, %66 : vector<8x1xf32>
    %cst_21 = arith.constant 3.000000e+01 : f32
    %69 = vector.broadcast %cst_21 : f32 to vector<8x1xf32>
    %70 = arith.divf %68, %69 : vector<8x1xf32>
    %cst_22 = arith.constant 5.000000e-01 : f32
    %71 = vector.broadcast %cst_22 : f32 to vector<8x1xf32>
    %72 = arith.addf %70, %71 : vector<8x1xf32>
    %cst_23 = arith.constant 1.000000e+00 : f32
    %73 = vector.broadcast %cst_23 : f32 to vector<8x1xf32>
    %74 = arith.select %63, %73, %72 : vector<8x1xi1>, vector<8x1xf32>
    %cst_24 = arith.constant 1.000000e+00 : f32
    %75 = vector.broadcast %cst_24 : f32 to vector<8x1xf32>
    %76 = arith.subf %75, %72 : vector<8x1xf32>
    %cst_25 = arith.constant 0.000000e+00 : f32
    %77 = vector.broadcast %cst_25 : f32 to vector<8x1xf32>
    %78 = arith.select %63, %77, %76 : vector<8x1xi1>, vector<8x1xf32>
    %cst_26 = arith.constant 1.500000e+01 : f32
    %79 = vector.broadcast %cst_26 : f32 to vector<8x1xf32>
    %80 = arith.cmpf olt, %20, %79 : vector<8x1xf32>
    %cst_27 = arith.constant 0.000000e+00 : f32
    %81 = vector.broadcast %cst_27 : f32 to vector<8x1xf32>
    %82 = arith.select %80, %78, %81 : vector<8x1xi1>, vector<8x1xf32>
    %cst_28 = arith.constant 0.000000e+00 : f32
    %83 = vector.broadcast %cst_28 : f32 to vector<8x1xf32>
    %84 = arith.select %80, %83, %78 : vector<8x1xi1>, vector<8x1xf32>
    %85 = tpu.iota {dimensions = array<i32: 1>} : vector<8x64xi32>
    %86 = vector.broadcast %22 : vector<8x1xi32> to vector<8x64xi32>
    %87 = arith.cmpi eq, %85, %86 : vector<8x64xi32>
    %88 = arith.extui %87 : vector<8x64xi1> to vector<8x64xi32>
    %89 = arith.sitofp %88 : vector<8x64xi32> to vector<8x64xf32>
    %90 = vector.broadcast %74 : vector<8x1xf32> to vector<8x64xf32>
    %91 = arith.mulf %90, %89 : vector<8x64xf32>
    %c13_i32 = arith.constant 13 : i32
    %92 = vector.broadcast %c13_i32 : i32 to vector<8x1xi32>
    %93 = arith.addi %92, %43 : vector<8x1xi32>
    %94 = vector.broadcast %93 : vector<8x1xi32> to vector<8x64xi32>
    %95 = arith.cmpi eq, %85, %94 : vector<8x64xi32>
    %96 = arith.extui %95 : vector<8x64xi1> to vector<8x64xi32>
    %97 = arith.sitofp %96 : vector<8x64xi32> to vector<8x64xf32>
    %98 = vector.broadcast %82 : vector<8x1xf32> to vector<8x64xf32>
    %99 = arith.mulf %98, %97 : vector<8x64xf32>
    %100 = arith.addf %91, %99 : vector<8x64xf32>
    %c26_i32 = arith.constant 26 : i32
    %101 = vector.broadcast %c26_i32 : i32 to vector<8x1xi32>
    %102 = arith.addi %101, %61 : vector<8x1xi32>
    %103 = vector.broadcast %102 : vector<8x1xi32> to vector<8x64xi32>
    %104 = arith.cmpi eq, %85, %103 : vector<8x64xi32>
    %105 = arith.extui %104 : vector<8x64xi1> to vector<8x64xi32>
    %106 = arith.sitofp %105 : vector<8x64xi32> to vector<8x64xf32>
    %107 = vector.broadcast %84 : vector<8x1xf32> to vector<8x64xf32>
    %108 = arith.mulf %107, %106 : vector<8x64xf32>
    %109 = arith.addf %100, %108 : vector<8x64xf32>
    %c39_i32 = arith.constant 39 : i32
    %110 = vector.broadcast %c39_i32 : i32 to vector<8x1xi32>
    %111 = arith.addi %110, %23 : vector<8x1xi32>
    %112 = vector.broadcast %111 : vector<8x1xi32> to vector<8x64xi32>
    %113 = arith.cmpi eq, %85, %112 : vector<8x64xi32>
    %114 = arith.extui %113 : vector<8x64xi1> to vector<8x64xi32>
    %115 = arith.sitofp %114 : vector<8x64xi32> to vector<8x64xf32>
    %116 = arith.addf %109, %115 : vector<8x64xf32>
    %c0_29 = arith.constant 0 : index
    %c0_30 = arith.constant 0 : index
    %117 = vector.load %arg2[%c0_29, %c0_30] : memref<216x128xf32, #tpu.memory_space<vmem>>, vector<4x32xf32>
    %cst_31 = arith.constant dense<0.000000e+00> : vector<8x32xf32>
    %118 = tpu.matmul %13, %117, %cst_31 {dimension_numbers = #tpu.dot_dimension_numbers<[1], [0], [0], [1], [0, 0, 1, 1], [], []>, precision = #tpu.contract_precision<fp32>} : vector<8x4xf32>, vector<4x32xf32>, vector<8x32xf32> -> vector<8x32xf32>
    %c8 = arith.constant 8 : index
    %c0_32 = arith.constant 0 : index
    %119 = vector.load %arg2[%c8, %c0_32] : memref<216x128xf32, #tpu.memory_space<vmem>>, vector<7x32xf32>
    %cst_33 = arith.constant dense<0.000000e+00> : vector<8x32xf32>
    %120 = tpu.matmul %3, %119, %cst_33 {dimension_numbers = #tpu.dot_dimension_numbers<[1], [0], [0], [1], [0, 0, 1, 1], [], []>, precision = #tpu.contract_precision<fp32>} : vector<8x7xf32>, vector<7x32xf32>, vector<8x32xf32> -> vector<8x32xf32>
    %121 = arith.addf %118, %120 : vector<8x32xf32>
    %c16 = arith.constant 16 : index
    %c0_34 = arith.constant 0 : index
    %122 = vector.load %arg2[%c16, %c0_34] : memref<216x128xf32, #tpu.memory_space<vmem>>, vector<64x32xf32>
    %cst_35 = arith.constant dense<0.000000e+00> : vector<8x32xf32>
    %123 = tpu.matmul %116, %122, %cst_35 {dimension_numbers = #tpu.dot_dimension_numbers<[1], [0], [0], [1], [0, 0, 1, 1], [], []>, precision = #tpu.contract_precision<fp32>} : vector<8x64xf32>, vector<64x32xf32>, vector<8x32xf32> -> vector<8x32xf32>
    %124 = arith.addf %121, %123 : vector<8x32xf32>
    %c2 = arith.constant 2 : index
    %c0_36 = arith.constant 0 : index
    %125 = vector.load %arg3[%c2, %c0_36] : memref<8x128xf32, #tpu.memory_space<vmem>>, vector<1x32xf32>
    %126 = vector.broadcast %125 : vector<1x32xf32> to vector<8x32xf32>
    %127 = arith.addf %124, %126 : vector<8x32xf32>
    %cst_37 = arith.constant 0.000000e+00 : f32
    %128 = vector.broadcast %cst_37 : f32 to vector<8x32xf32>
    %129 = arith.maximumf %127, %128 : vector<8x32xf32>
    %c80 = arith.constant 80 : index
    %c0_38 = arith.constant 0 : index
    %130 = vector.load %arg2[%c80, %c0_38] : memref<216x128xf32, #tpu.memory_space<vmem>>, vector<32x32xf32>
    %cst_39 = arith.constant dense<0.000000e+00> : vector<8x32xf32>
    %131 = tpu.matmul %129, %130, %cst_39 {dimension_numbers = #tpu.dot_dimension_numbers<[1], [0], [0], [1], [0, 0, 1, 1], [], []>, precision = #tpu.contract_precision<fp32>} : vector<8x32xf32>, vector<32x32xf32>, vector<8x32xf32> -> vector<8x32xf32>
    %c3 = arith.constant 3 : index
    %c0_40 = arith.constant 0 : index
    %132 = vector.load %arg3[%c3, %c0_40] : memref<8x128xf32, #tpu.memory_space<vmem>>, vector<1x32xf32>
    %133 = vector.broadcast %132 : vector<1x32xf32> to vector<8x32xf32>
    %134 = arith.addf %131, %133 : vector<8x32xf32>
    %cst_41 = arith.constant 0.000000e+00 : f32
    %135 = vector.broadcast %cst_41 : f32 to vector<8x32xf32>
    %136 = arith.maximumf %134, %135 : vector<8x32xf32>
    %c112 = arith.constant 112 : index
    %c0_42 = arith.constant 0 : index
    %137 = vector.load %arg2[%c112, %c0_42] : memref<216x128xf32, #tpu.memory_space<vmem>>, vector<32x23xf32>
    %cst_43 = arith.constant dense<0.000000e+00> : vector<8x23xf32>
    %138 = tpu.matmul %136, %137, %cst_43 {dimension_numbers = #tpu.dot_dimension_numbers<[1], [0], [0], [1], [0, 0, 1, 1], [], []>, precision = #tpu.contract_precision<fp32>} : vector<8x32xf32>, vector<32x23xf32>, vector<8x23xf32> -> vector<8x23xf32>
    %c4 = arith.constant 4 : index
    %c0_44 = arith.constant 0 : index
    %139 = vector.load %arg3[%c4, %c0_44] : memref<8x128xf32, #tpu.memory_space<vmem>>, vector<1x23xf32>
    %140 = vector.broadcast %139 : vector<1x23xf32> to vector<8x23xf32>
    %141 = arith.addf %138, %140 : vector<8x23xf32>
    %cst_45 = arith.constant 0.000000e+00 : f32
    %142 = vector.broadcast %cst_45 : f32 to vector<8x23xf32>
    %143 = arith.maximumf %141, %142 : vector<8x23xf32>
    %c144 = arith.constant 144 : index
    %c0_46 = arith.constant 0 : index
    %144 = vector.load %arg2[%c144, %c0_46] : memref<216x128xf32, #tpu.memory_space<vmem>>, vector<23x13xf32>
    %cst_47 = arith.constant dense<0.000000e+00> : vector<8x13xf32>
    %145 = tpu.matmul %143, %144, %cst_47 {dimension_numbers = #tpu.dot_dimension_numbers<[1], [0], [0], [1], [0, 0, 1, 1], [], []>, precision = #tpu.contract_precision<fp32>} : vector<8x23xf32>, vector<23x13xf32>, vector<8x13xf32> -> vector<8x13xf32>
    %c5 = arith.constant 5 : index
    %c0_48 = arith.constant 0 : index
    %146 = vector.load %arg3[%c5, %c0_48] : memref<8x128xf32, #tpu.memory_space<vmem>>, vector<1x13xf32>
    %147 = vector.broadcast %146 : vector<1x13xf32> to vector<8x13xf32>
    %148 = arith.addf %145, %147 : vector<8x13xf32>
    %cst_49 = arith.constant 0.000000e+00 : f32
    %149 = vector.broadcast %cst_49 : f32 to vector<8x13xf32>
    %150 = arith.maximumf %148, %149 : vector<8x13xf32>
    %c168 = arith.constant 168 : index
    %c0_50 = arith.constant 0 : index
    %151 = vector.load %arg2[%c168, %c0_50] : memref<216x128xf32, #tpu.memory_space<vmem>>, vector<13x4xf32>
    %cst_51 = arith.constant dense<0.000000e+00> : vector<8x4xf32>
    %152 = tpu.matmul %150, %151, %cst_51 {dimension_numbers = #tpu.dot_dimension_numbers<[1], [0], [0], [1], [0, 0, 1, 1], [], []>, precision = #tpu.contract_precision<fp32>} : vector<8x13xf32>, vector<13x4xf32>, vector<8x4xf32> -> vector<8x4xf32>
    %c6 = arith.constant 6 : index
    %c0_52 = arith.constant 0 : index
    %153 = vector.load %arg3[%c6, %c0_52] : memref<8x128xf32, #tpu.memory_space<vmem>>, vector<1x4xf32>
    %154 = vector.broadcast %153 : vector<1x4xf32> to vector<8x4xf32>
    %155 = arith.addf %152, %154 : vector<8x4xf32>
    %c184 = arith.constant 184 : index
    %c0_53 = arith.constant 0 : index
    %156 = vector.load %arg2[%c184, %c0_53] : memref<216x128xf32, #tpu.memory_space<vmem>>, vector<32x67xf32>
    %cst_54 = arith.constant dense<0.000000e+00> : vector<8x67xf32>
    %157 = tpu.matmul %136, %156, %cst_54 {dimension_numbers = #tpu.dot_dimension_numbers<[1], [0], [0], [1], [0, 0, 1, 1], [], []>, precision = #tpu.contract_precision<fp32>} : vector<8x32xf32>, vector<32x67xf32>, vector<8x67xf32> -> vector<8x67xf32>
    %c7 = arith.constant 7 : index
    %c0_55 = arith.constant 0 : index
    %158 = vector.load %arg3[%c7, %c0_55] : memref<8x128xf32, #tpu.memory_space<vmem>>, vector<1x67xf32>
    %159 = vector.broadcast %158 : vector<1x67xf32> to vector<8x67xf32>
    %160 = arith.addf %157, %159 : vector<8x67xf32>
    %161 = vector.extract_strided_slice %160 {offsets = [0, 0], sizes = [8, 12], strides = [1, 1]} : vector<8x67xf32> to vector<8x12xf32>
    %cst_56 = arith.constant dense<0xFF800000> : vector<8xf32>
    %162 = vector.multi_reduction <maximumf>, %161, %cst_56 [1] : vector<8x12xf32> to vector<8xf32>
    %163 = vector.shape_cast %162 : vector<8xf32> to vector<8x1xf32>
    %164 = vector.broadcast %163 : vector<8x1xf32> to vector<8x12xf32>
    %165 = arith.subf %161, %164 : vector<8x12xf32>
    %166 = math.exp %165 : vector<8x12xf32>
    %cst_57 = arith.constant dense<0.000000e+00> : vector<8xf32>
    %167 = vector.multi_reduction <add>, %166, %cst_57 [1] : vector<8x12xf32> to vector<8xf32>
    %168 = vector.shape_cast %167 : vector<8xf32> to vector<8x1xf32>
    %169 = tpu.reciprocal %168 : vector<8x1xf32> -> vector<8x1xf32>
    %170 = vector.broadcast %169 : vector<8x1xf32> to vector<8x12xf32>
    %171 = arith.mulf %166, %170 : vector<8x12xf32>
    %172 = vector.extract_strided_slice %160 {offsets = [0, 12], sizes = [8, 31], strides = [1, 1]} : vector<8x67xf32> to vector<8x31xf32>
    %cst_58 = arith.constant dense<0xFF800000> : vector<8xf32>
    %173 = vector.multi_reduction <maximumf>, %172, %cst_58 [1] : vector<8x31xf32> to vector<8xf32>
    %174 = vector.shape_cast %173 : vector<8xf32> to vector<8x1xf32>
    %175 = vector.broadcast %174 : vector<8x1xf32> to vector<8x31xf32>
    %176 = arith.subf %172, %175 : vector<8x31xf32>
    %177 = math.exp %176 : vector<8x31xf32>
    %cst_59 = arith.constant dense<0.000000e+00> : vector<8xf32>
    %178 = vector.multi_reduction <add>, %177, %cst_59 [1] : vector<8x31xf32> to vector<8xf32>
    %179 = vector.shape_cast %178 : vector<8xf32> to vector<8x1xf32>
    %180 = tpu.reciprocal %179 : vector<8x1xf32> -> vector<8x1xf32>
    %181 = vector.broadcast %180 : vector<8x1xf32> to vector<8x31xf32>
    %182 = arith.mulf %177, %181 : vector<8x31xf32>
    %183 = vector.extract_strided_slice %160 {offsets = [0, 43], sizes = [8, 24], strides = [1, 1]} : vector<8x67xf32> to vector<8x24xf32>
    %cst_60 = arith.constant dense<0xFF800000> : vector<8xf32>
    %184 = vector.multi_reduction <maximumf>, %183, %cst_60 [1] : vector<8x24xf32> to vector<8xf32>
    %185 = vector.shape_cast %184 : vector<8xf32> to vector<8x1xf32>
    %186 = vector.broadcast %185 : vector<8x1xf32> to vector<8x24xf32>
    %187 = arith.subf %183, %186 : vector<8x24xf32>
    %188 = math.exp %187 : vector<8x24xf32>
    %cst_61 = arith.constant dense<0.000000e+00> : vector<8xf32>
    %189 = vector.multi_reduction <add>, %188, %cst_61 [1] : vector<8x24xf32> to vector<8xf32>
    %190 = vector.shape_cast %189 : vector<8xf32> to vector<8x1xf32>
    %191 = tpu.reciprocal %190 : vector<8x1xf32> -> vector<8x1xf32>
    %192 = vector.broadcast %191 : vector<8x1xf32> to vector<8x24xf32>
    %193 = arith.mulf %188, %192 : vector<8x24xf32>
    %cst_62 = arith.constant 0.000000e+00 : f32
    %194 = vector.broadcast %cst_62 : f32 to vector<8x128xf32>
    %c0_63 = arith.constant 0 : index
    %c0_64 = arith.constant 0 : index
    %195 = vector.load %arg4[%c0_63, %c0_64] : memref<8x128xf32, #tpu.memory_space<vmem>>, vector<8x128xf32>
    tpu.vector_store %arg4[%c0_63, %c0_64], %194 {strides = array<i32>} : memref<8x128xf32, #tpu.memory_space<vmem>>, vector<8x128xf32>,
    %c0_65 = arith.constant 0 : index
    %c0_66 = arith.constant 0 : index
    %196 = vector.load %arg4[%c0_65, %c0_66] : memref<8x128xf32, #tpu.memory_space<vmem>>, vector<8x4xf32>
    tpu.vector_store %arg4[%c0_65, %c0_66], %155 {strides = array<i32>} : memref<8x128xf32, #tpu.memory_space<vmem>>, vector<8x4xf32>,
    %c0_67 = arith.constant 0 : index
    %c4_68 = arith.constant 4 : index
    %197 = vector.load %arg4[%c0_67, %c4_68] : memref<8x128xf32, #tpu.memory_space<vmem>>, vector<8x12xf32>
    tpu.vector_store %arg4[%c0_67, %c4_68], %171 {strides = array<i32>} : memref<8x128xf32, #tpu.memory_space<vmem>>, vector<8x12xf32>,
    %c0_69 = arith.constant 0 : index
    %c16_70 = arith.constant 16 : index
    %198 = vector.load %arg4[%c0_69, %c16_70] : memref<8x128xf32, #tpu.memory_space<vmem>>, vector<8x31xf32>
    tpu.vector_store %arg4[%c0_69, %c16_70], %182 {strides = array<i32>} : memref<8x128xf32, #tpu.memory_space<vmem>>, vector<8x31xf32>,
    %c0_71 = arith.constant 0 : index
    %c47 = arith.constant 47 : index
    %199 = vector.load %arg4[%c0_71, %c47] : memref<8x128xf32, #tpu.memory_space<vmem>>, vector<8x24xf32>
    tpu.vector_store %arg4[%c0_71, %c47], %193 {strides = array<i32>} : memref<8x128xf32, #tpu.memory_space<vmem>>, vector<8x24xf32>,
    return
  }
  func.func @transform_0(%arg0: i32) -> (i32, i32) {
    %c0_i32 = arith.constant 0 : i32
    %c0_i32_0 = arith.constant 0 : i32
    return %arg0, %c0_i32 : i32, i32
  }
  func.func @transform_1(%arg0: i32) -> (i32, i32) {
    %c0_i32 = arith.constant 0 : i32
    %c0_i32_0 = arith.constant 0 : i32
    %c0_i32_1 = arith.constant 0 : i32
    return %c0_i32, %c0_i32_0 : i32, i32
  }
  func.func @transform_2(%arg0: i32) -> (i32, i32) {
    %c0_i32 = arith.constant 0 : i32
    %c0_i32_0 = arith.constant 0 : i32
    %c0_i32_1 = arith.constant 0 : i32
    return %c0_i32, %c0_i32_0 : i32, i32
  }
  func.func @transform_3(%arg0: i32) -> (i32, i32) {
    %c0_i32 = arith.constant 0 : i32
    %c0_i32_0 = arith.constant 0 : i32
    return %arg0, %c0_i32 : i32, i32
  }
}

</mosaic_0001>

<bundles_post_ra>
// kernel: tpu_custom_call.1
= control target key start
LH: loop header
LB: loop body
LE: loop exit
PB: predicated region body
PF: predicated region fallthrough
CT: control target
= control target key end

     0   :  { %8 = vsyncpa [#allocation3], 0  ;;  %s5814_s0 = inlined_call_operand.hbm [shape: f32[8,14], index: 0, kind: input, shape index: {}]   ;;  %s5815_s1 = inlined_call_operand.hbm [shape: f32[216,128], index: 1, kind: input, shape index: {}]   ;;  %s5816_s2 = inlined_call_operand.hbm [shape: f32[8,128], index: 2, kind: input, shape index: {}]   ;;  %s5817_s3 = inlined_call_operand.hbm [shape: f32[8,128], index: 3, kind: output, shape index: {}]  }
   0x1   :  { %9 = vsyncpa [#allocation6], 0 }
   0x2   :  { %10 = vsyncpa [#allocation4], 0  ;;  %s5021_s12 = smov [#allocation5]  }
   0x3   :  { %s26_s13 = sshll.u32 %s5021_s12, 4  ;;  %s27_s13 = int_to_ptr.vmem [resolvable:$true] %s26_s13 }
   0x4   :  { %s4943_s14 = scalar_lea.vmem %s27_s13, 3456  ;;  %p4948_p1 = scmp.lt.s32.totalorder %s27_s13, %s27_s13 }
   0x5   :  { %p4944_p0 = scmp.ne.s32.totalorder %s27_s13, %s4943_s14  ;;  %p4949_p2 = scmp.lt.s32.totalorder %s4943_s14, %s4943_s14 }
   0x7   :  { %p4950_p3 = por %p4949_p2, %p4948_p1 }
   0x9   :  { %p4951_p4 = pnand %p4950_p3, %p4944_p0 }
   0xb   :  { %4954 = shalt.err (!%p4951_p4)
}
   0xc   :  { %s5022_s15 = smov 128   ;;  %s5023_s16 = smov 8  }
   0xd   :  { %32 = dma.hbm_to_vmem [thread:$0]  %s5815_s1, 3456, %s27_s13, [#allocation6], %s5022_s15, %s5022_s15, %s5023_s16  }
   0xe   :  { %s5024_s19 = smov [#allocation2]   ;;  %s5025_s21 = smov [#allocation7]  }
   0xf   :  { %s17_s20 = sshll.u32 %s5024_s19, 4  ;;  %s39_s22 = sshll.u32 %s5025_s21, 4  ;;  %s18_s20 = int_to_ptr.vmem [resolvable:$true] %s17_s20  ;;  %s40_s22 = int_to_ptr.vmem [resolvable:$true] %s39_s22 }
  0x10   :  { %s4963_s23 = scalar_lea.vmem %s18_s20, 128  ;;  %p4968_p6 = scmp.lt.s32.totalorder %s18_s20, %s18_s20 }
  0x11   :  { %p4964_p5 = scmp.ne.s32.totalorder %s18_s20, %s4963_s23  ;;  %p4969_p7 = scmp.lt.s32.totalorder %s4963_s23, %s4963_s23 }
  0x13   :  { %p4970_p8 = por %p4969_p7, %p4968_p6 }
  0x15   :  { %p4971_p9 = pnand %p4970_p8, %p4964_p5 }
  0x17   :  { %4974 = shalt.err (!%p4971_p9)
}
  0x18   :  { %20 = dma.hbm_to_vmem [thread:$0]  %s5814_s0, 128, %s18_s20, [#allocation3]  }
  0x19   :  { %s4983_s26 = scalar_lea.vmem %s40_s22, 128  ;;  %p4988_p11 = scmp.lt.s32.totalorder %s40_s22, %s40_s22 }
  0x1a   :  { %p4984_p10 = scmp.ne.s32.totalorder %s40_s22, %s4983_s26  ;;  %p4989_p12 = scmp.lt.s32.totalorder %s4983_s26, %s4983_s26 }
  0x1c   :  { %p4990_p13 = por %p4989_p12, %p4988_p11 }
  0x1e   :  { %p4991_p0 = pnand %p4990_p13, %p4984_p10 }
  0x20   :  { %4994 = shalt.err (!%p4991_p0)
}
  0x21   :  { %42 = dma.hbm_to_vmem [thread:$0]  %s5816_s2, 128, %s40_s22, [#allocation6]  }
  0x22   :  { %5015 = dma.done.wait [#allocation3], 128  }
  0x23   :  { %5016 = vsyncadd [#allocation3], 4294967168 }
  0x24   :  { %5017 = dma.done.wait [#allocation6], 3584  }
  0x25   :  { %5018 = vsyncadd [#allocation6], 4294963712  ;;  %v4197_v0 = vld [vmem:[#allocation7] ss:$0 sm:$0xff]  ;;  %s5026_s0 = smov 3   ;;  %s5027_s2 = smov 127  }
  0x26   :  { %v5070_v1 = vld [vmem:[#allocation2] sm:$0xff]  ;;  %60 = vrot.lane.b32.xlu0 %v4197_v0, %s5026_s0  ;;  %s5028_s28 = smov 121   ;;  %v5029_v12 = vmov 0   ;;  %v5030_v15 = vmov 1   ;;  %s5031_s29 = smov 7   ;;  %v5032_v20 = vmov 0.0  }
  0x27   :  { %vm79_vm0 = vcmp.eq.f32.partialorder %v5070_v1, 0.0  ;;  %v4198_v2 = vld [vmem:[#allocation7 + $0x1] ss:$0 sm:$0xff]  ;;  %v4891_v10 = vtrunc.f32 %v5070_v1  ;;  %4918 = vset.pattern.permute.xlu1 %v5029_v12  ;;  %4917 = vset.pattern.permute.xlu0 %v5029_v12  ;;  %v192_v19 = vld [vmem:[#allocation5 + $0x8] sm:$0x7f]  ;;  %4161 = vst [vmem:[#allocation8] sm:$0xff] %v5032_v20 }
  0x28   :  { %v5076_v3 = vsel %vm79_vm0, 15.0, %v5070_v1  ;;  %4423 = vmatprep.subr.mxu0 %v5032_v20  ;;  %4428 = vmatprep.subr.mxu1 %v5032_v20  ;;  %vm199_vm1 = vcmask 1046528   ;;  %vm196_vm2 = vcmask 56320   ;;  %vm5033_vm3 = vmmov 0   ;;  %s5034_s30 = smov 1   ;;  %s5035_s4 = smov 118  }
  0x29   :  { %v4202_v4 = vadd.f32 -15.0, %v5076_v3  ;;  %v5081_v11 = vcvt.f32.s32 %v4891_v10  ;;  %v201_v22 = vsel %vm199_vm1, %v192_v19, 0  ;;  %4425 = vmatprep.mubr.msk.f32.mxu0 %vm5033_vm3, %v5032_v20  ;;  %4430 = vmatprep.mubr.msk.f32.mxu1 %vm5033_vm3, %v5032_v20  ;;  %v191_v49 = vld [vmem:[#allocation5] sm:$0xf]  ;;  %vm655_vm4 = vcmask 1043456   ;;  %s5037_s5 = smov 85  }
  0x2a   :  { %69 = vrot.lane.b32.xlu0 %v4198_v2, %s5026_s0  ;;  %v234_v24 = vand.u32 4294901760, %v201_v22  ;;  %v657_v50 = vsel %vm655_vm4, %v191_v49, 0  ;;  %vm73_vm12 = vcmp.ne.f32.partialorder %v5070_v1, 0.0  ;;  %vm134_vm14 = vcmp.lt.f32.partialorder %v5076_v3, 15.0  ;;  %s5038_s6 = smov 116   ;;  %s5039_s7 = smov 4  }
  0x2b   :  { %v118_v5 = vand.u32 2147483647, %v4202_v4  ;;  %v4199_v36 = vadd.s32 4294967294, %v5081_v11  ;;  %v101_v41 = vsub.s32 0, %v5081_v11  ;;  %v5127_v51 = vand.u32 4294901760, %v657_v50  ;;  %s5040_s8 = smov [#allocation8]  }
  0x2c   :  { %4424 = vmatpush3.msra.mxu0 %v234_v24  ;;  %v311_v27 = vsub.f32 %v201_v22, %v234_v24  ;;  %vm100_vm8 = vcmp.lt.s32.totalorder %v5081_v11, 0  ;;  %vm652_vm15 = vcmask 31744   ;;  %s4187_s9 = sshll.u32 %s5040_s8, 4  ;;  %s4188_s9 = int_to_ptr.vmem [resolvable:$true] %s4187_s9 }
  0x2d   :  { %v119_v6 = vsub.f32 15.0, %v118_v5  ;;  %4433 = vmatprep.subr.mxu0 %v5032_v20  ;;  %v84_v37 = vsub.s32 0, %v4199_v36  ;;  %v4201_v42 = vmin.u32 %v5081_v11, %v101_v41  ;;  %vm83_vm5 = vcmp.lt.s32.totalorder %v4199_v36, 0  ;;  %s4995_s10 = scalar_lea.vmem %s4188_s9, 128  ;;  %p5000_p2 = scmp.lt.s32.totalorder %s4188_s9, %s4188_s9 }
  0x2e   :  { %v312_v29 = vand.u32 4294901760, %v311_v27  ;;  %v5130_v54 = vsub.f32 %v657_v50, %v5127_v51  ;;  %p4996_p1 = scmp.ne.s32.totalorder %s4188_s9, %s4995_s10  ;;  %p5001_p3 = scmp.lt.s32.totalorder %s4995_s10, %s4995_s10 }
  0x2f   :  { %v121_v7 = vmul.f32 0.033333335, %v119_v6  ;;  %v4200_v38 = vmin.u32 %v4199_v36, %v84_v37  ;;  %v5123_v44 = vmul.u32.u64.low 2863311531, %v4201_v42  ;;  %v5124_v45 = vmul.u32.u64.high 2863311531, %v4201_v42, %v5123_v44  ;;  %v1110_v36 = vld [vmem:[#allocation5 + $0x38] sm:$0xff] }
  0x30   :  { %v313_v31 = vsub.f32 %v311_v27, %v312_v29  ;;  %v768_v55 = vand.u32 4294901760, %v5130_v54  ;;  %p5002_p4 = por %p5001_p3, %p5000_p2 }
  0x31   :  { %v122_v8 = vadd.f32 0.5, %v121_v7  ;;  %v5117_v39 = vmul.u32.u64.low 2863311531, %v4200_v38  ;;  %v5118_v40 = vmul.u32.u64.high 2863311531, %v4200_v38, %v5117_v39  ;;  %v106_v48 = vshrl.u32 %v5124_v45, 3 }
  0x32   :  { %v314_v33 = vand.u32 4294901760, %v313_v31  ;;  %v769_v58 = vsub.f32 %v5130_v54, %v768_v55  ;;  %v5156_v39 = vand.u32 4294901760, %v1110_v36  ;;  %p5003_p5 = pnand %p5002_p4, %p4996_p1 }
  0x33   :  { %v128_v9 = vsub.f32 1.0, %v122_v8  ;;  %124 = vrot.lane.b32.xlu0 %v122_v8, %s5027_s2  ;;  %v89_v43 = vshrl.u32 %v5118_v40, 3  ;;  %v107_v53 = vmul.u32 12, %v106_v48 }
  0x34   :  { %4429 = vmatpush3.msra.mxu1 %v314_v33  ;;  %v770_v59 = vand.u32 4294901760, %v769_v58  ;;  %v5168_v48 = vsub.f32 %v1110_v36, %v5156_v39 }
  0x35   :  { %130 = vrot.lane.b32.xlu1 %v128_v9, %s5027_s2  ;;  %4438 = vmatprep.subr.mxu1 %v5032_v20  ;;  %v90_v46 = vmul.u32 12, %v89_v43  ;;  %v108_v57 = vsub.s32 %v4201_v42, %v107_v53  ;;  %v1108_v42 = vld [vmem:[#allocation5 + $0x28] sm:$0xff]  ;;  %v1106_v53 = vld [vmem:[#allocation5 + $0x18] sm:$0xff] }
  0x36   :  { %v5170_v49 = vand.u32 4294901760, %v1108_v42 }
  0x37   :  { %194 = vrot.lane.b32.xlu0 %v5070_v1, %s5028_s28  ;;  %v91_v47 = vsub.s32 %v4200_v38, %v90_v46  ;;  %v109_v60 = vsub.s32 0, %v108_v57  ;;  %v1109_v38 = vld [vmem:[#allocation5 + $0x30] sm:$0xff] }
  0x38   :  { %v5162_v44 = vand.u32 4294901760, %v1109_v38 }
  0x39   :  { %v92_v52 = vsub.s32 0, %v91_v47  ;;  %v110_v62 = vsel %vm100_vm8, %v109_v60, %v108_v57  ;;  %v1105_v60 = vld [vmem:[#allocation5 + $0x10] sm:$0xff]  ;;  %vm3158_vm8 = vcmask 1044480  }
  0x3a   :  { %vm111_vm10 = vcmp.ne.s32.totalorder %v110_v62, 0  ;;  %vm112_vm11 = vcmp.lt.s32.totalorder %v110_v62, 0  ;;  %v114_v2 = vadd.s32 12, %v110_v62 }
  0x3b   :  { %144 = vperm.xlu0 %4917, %v5081_v11   ;;  %v93_v56 = vsel %vm83_vm5, %v92_v52, %v91_v47  ;;  %vm113_vm13 = vmand %vm112_vm11, %vm111_vm10  ;;  %v1107_v47 = vld [vmem:[#allocation5 + $0x20] sm:$0xff]  ;;  %vm4127_vm10 = vcmask 351328   ;;  %vm4115_vm11 = vcmask 97280  }
  0x3c   :  { %vm94_vm6 = vcmp.ne.s32.totalorder %v93_v56, 0  ;;  %vm95_vm7 = vcmp.lt.s32.totalorder %v93_v56, 0  ;;  %v97_v61 = vadd.s32 12, %v93_v56  ;;  %v115_v7 = vsel %vm113_vm13, %v114_v2, %v110_v62 }
  0x3d   :  { %vm96_vm9 = vmand %vm95_vm7, %vm94_vm6  ;;  %v116_v8 = vadd.s32 1, %v115_v7  ;;  %v5181_v57 = vand.u32 4294901760, %v1107_v47  ;;  %v5189_v62 = vsub.f32 %v1108_v42, %v5170_v49  ;;  %vm1113_vm6 = vcmask 523264  }
  0x3e   :  { %v98_v63 = vsel %vm96_vm9, %v97_v61, %v93_v56  ;;  %v5179_v56 = vsub.f32 %v1109_v38, %v5162_v44  ;;  %v1233_v61 = vand.u32 4294901760, %v5168_v48  ;;  %vm1671_vm7 = vcmask 261120  }
  0x3f   :  { %4919 = vset.pattern.permute.xlu0 %v5030_v15  ;;  %v99_v0 = vadd.s32 1, %v98_v63  ;;  %v5191_v63 = vand.u32 4294901760, %v1106_v53  ;;  %vm3154_vm9 = vcmask 105472   ;;  %vm4155_vm13 = vcmask 195584  }
  0x41   :  { %v155_v6 = vadd.s32 13, %v99_v0 }
  0x98   :  { %v61_v13 = vpop.permute.xlu0 %60 }
  0x99   :  { %v63_v14 = vsub.f32 %v5070_v1, %v61_v13  ;;  %v169_v13 = vadd.s32 26, %v116_v8 }
  0x9c   :  { %v70_v16 = vpop.permute.xlu0 %69 }
  0x9d   :  { %v72_v17 = vmul.f32 %v70_v16, %v63_v14  ;;  %v183_v14 = vadd.s32 39, %v5081_v11  ;;  %v5036_v16 = vmov 2  }
  0x9f   :  { %75 = vrot.lane.b32.xlu1 %v72_v17, %s5031_s29 }
  0xa5   :  { %v5086_v18 = vpop.permute.xlu0 %124 }
  0xa6   :  { %v127_v9 = vsel %vm79_vm0, 1.0, %v5086_v18 }
  0xa7   :  { %v131_v21 = vpop.permute.xlu1 %130 }
  0xa8   :  { %v133_v23 = vsel %vm79_vm0, 0.0, %v131_v21 }
  0xa9   :  { %136 = vrot.lane.b32.xlu1 %v133_v23, %s5034_s30  ;;  %v195_v25 = vpop.permute.xlu0 %194 }
  0xaa   :  { %v197_v26 = vsel %vm196_vm2, %v195_v25, 0 }
  0xab   :  { %v269_v28 = vand.u32 4294901760, %v197_v26 }
  0xad   :  { %v270_v30 = vsub.f32 %v197_v26, %v269_v28  ;;  %4431 = vmatmul.mubr.f32.vlgmr.msra.gmra.mxu1 %v269_v28 }
  0xae   :  { %4439 = vmatpush3.msra.mxu1 %v234_v24  ;;  %4440 = vmatprep.mubr.msk.f32.mxu1 %vm5033_vm3, %v5032_v20 }
  0xaf   :  { %v271_v32 = vand.u32 4294901760, %v270_v30  ;;  %4448 = vmatprep.subr.mxu1 %v5032_v20 }
  0xb1   :  { %v272_v34 = vsub.f32 %v270_v30, %v271_v32  ;;  %4441 = vmatmul.mubr.f32.vlgmr.msra.gmra.mxu1 %v271_v32  ;;  %v1111_v32 = vld [vmem:[#allocation5 + $0x40] sm:$0xff] }
  0xb2   :  { %4449 = vmatpush3.msra.mxu1 %v234_v24  ;;  %4450 = vmatprep.mubr.msk.f32.mxu1 %vm5033_vm3, %v5032_v20 }
  0xb3   :  { %v273_v35 = vand.u32 4294901760, %v272_v34  ;;  %4458 = vmatprep.subr.mxu1 %v5032_v20 }
  0xb5   :  { %4426 = vmatmul.mubr.f32.vlgmr.msra.gmra.mxu0 %v273_v35  ;;  %4451 = vmatmul.mubr.f32.vlgmr.msra.gmra.mxu1 %v269_v28  ;;  %v5151_v35 = vand.u32 4294901760, %v1111_v32 }
  0xb6   :  { %4434 = vmatpush3.msra.mxu0 %v311_v27  ;;  %4435 = vmatprep.mubr.msk.f32.mxu0 %vm5033_vm3, %v5032_v20 }
  0xb7   :  { %4443 = vmatprep.subr.mxu0 %v5032_v20  ;;  %4460 = vmatprep.mubr.msk.f32.mxu1 %vm5033_vm3, %v5032_v20  ;;  %v5159_v41 = vsub.f32 %v1111_v32, %v5151_v35 }
  0xb8   :  { %4459 = vmatpush3.msra.mxu1 %v770_v59 }
  0xb9   :  { %4436 = vmatmul.mubr.f32.vlgmr.msra.gmra.mxu0 %v270_v30  ;;  %4468 = vmatprep.subr.mxu1 %v5032_v20  ;;  %v1226_v52 = vand.u32 4294901760, %v5159_v41 }
  0xba   :  { %4444 = vmatpush3.msra.mxu0 %v312_v29  ;;  %4445 = vmatprep.mubr.msk.f32.mxu0 %vm5033_vm3, %v5032_v20 }
  0xbb   :  { %4453 = vmatprep.subr.mxu0 %v5032_v20  ;;  %v1227_v2 = vsub.f32 %v5159_v41, %v1226_v52 }
  0xbd   :  { %4446 = vmatmul.mubr.f32.vlgmr.msra.gmra.mxu0 %v269_v28  ;;  %v1112_v28 = vld [vmem:[#allocation5 + $0x48] sm:$0xff] }
  0xbe   :  { %4455 = vmatprep.mubr.msk.f32.mxu0 %vm5033_vm3, %v5032_v20  ;;  %4454 = vmatpush3.msra.mxu0 %v5127_v51  ;;  %v5147_v33 = vand.u32 4294901760, %v1112_v28 }
  0xbf   :  { %4463 = vmatprep.subr.mxu0 %v5032_v20 }
  0xc0   :  { %v5154_v37 = vsub.f32 %v1112_v28, %v5147_v33 }
  0xc2   :  { %v1219_v46 = vand.u32 4294901760, %v5154_v37 }
  0xc4   :  { %v1220_v59 = vsub.f32 %v5154_v37, %v1219_v46 }
  0xc6   :  { %v1221_v8 = vand.u32 4294901760, %v1220_v59 }
 0x111   :  { %v76_v4 = vpop.permute.xlu1 %75 }
 0x112   :  { %v78_v5 = vsel %vm73_vm12, 0.0, %v76_v4  ;;  %v1240_v4 = vand.u32 4294901760, %v5179_v56  ;;  %vm4138_vm12 = vcmask 252928  }
 0x113   :  { %650 = vrot.lane.b32.xlu1 %v78_v5, %s5035_s4  ;;  %v5201_v5 = vsub.f32 %v1107_v47, %v5181_v57 }
 0x117   :  { %157 = vperm.xlu1 %4918, %v155_v6   ;;  %v5203_v6 = vand.u32 4294901760, %v1105_v60 }
 0x11b   :  { %v137_v10 = vpop.permute.xlu1 %136  ;;  %151 = vperm.xlu1 %4918, %v127_v9   ;;  %v141_v9 = vlaneseq }
 0x11c   :  { %v139_v12 = vsel %vm134_vm14, %v137_v10, 0.0  ;;  %v140_v17 = vsel %vm134_vm14, 0.0, %v137_v10  ;;  %v1234_v10 = vsub.f32 %v5168_v48, %v1233_v61  ;;  %vm4167_vm14 = vcmask 130080  }
 0x11d   :  { %164 = vperm.xlu0 %4919, %v139_v12   ;;  %v5211_v12 = vsub.f32 %v1106_v53, %v5191_v63 }
 0x11f   :  { %171 = vperm.xlu1 %4918, %v169_v13   ;;  %v1228_v13 = vand.u32 4294901760, %v1227_v2 }
 0x121   :  { %4921 = vset.pattern.permute.xlu0 %v5036_v16  ;;  %v145_v16 = vpop.permute.xlu0 %144 }
 0x122   :  { %185 = vperm.xlu0 %4921, %v183_v14  }
 0x123   :  { %4920 = vset.pattern.permute.xlu1 %v5030_v15 }
 0x124   :  { %178 = vperm.xlu1 %4920, %v140_v17   ;;  %v1241_v17 = vsub.f32 %v5179_v56, %v1240_v4 }
 0x16d   :  { %v351_v19 = vpop.f32.mrf.mxu1 }
 0x16f   :  { %v4432_v18 = vpop.f32.mrf.mxu1 }
 0x170   :  { %v142_v18 = vand.u32 127, %v141_v9 }
 0x171   :  { %v499_v22 = vpop.f32.mrf.mxu1 }
 0x172   :  { %vm146_vm0 = vcmp.eq.s32.totalorder %v142_v18, %v145_v16 }
 0x173   :  { %v4442_v24 = vpop.f32.mrf.mxu1 }
 0x174   :  { %v1242_v24 = vand.u32 4294901760, %v1241_v17 }
 0x175   :  { %v275_v1 = vpop.f32.mrf.mxu0  ;;  %v645_v27 = vpop.f32.mrf.mxu1 }
 0x176   :  { %v352_v21 = vadd.f32 %v351_v19, %v275_v1  ;;  %v1254_v19 = vand.u32 4294901760, %v5201_v5  ;;  %v5222_v1 = vsub.f32 %v1105_v60, %v5203_v6 }
 0x177   :  { %v4427_v3 = vpop.f32.mrf.mxu0  ;;  %v4452_v30 = vpop.f32.mrf.mxu1 }
 0x179   :  { %v425_v23 = vpop.f32.mrf.mxu0 }
 0x17a   :  { %v426_v25 = vadd.f32 %v425_v23, %v352_v21  ;;  %v1235_v21 = vand.u32 4294901760, %v1234_v10 }
 0x17b   :  { %v4437_v26 = vpop.f32.mrf.mxu0 }
 0x17c   :  { %v500_v11 = vadd.f32 %v499_v22, %v426_v25  ;;  %v1261_v22 = vand.u32 4294901760, %v5211_v12  ;;  %v1255_v25 = vsub.f32 %v5201_v5, %v1254_v19  ;;  %v1268_v26 = vand.u32 4294901760, %v5222_v1 }
 0x17d   :  { %v573_v29 = vpop.f32.mrf.mxu0 }
 0x17e   :  { %v574_v31 = vadd.f32 %v573_v29, %v500_v11  ;;  %v1256_v29 = vand.u32 4294901760, %v1255_v25  ;;  %v1269_v30 = vsub.f32 %v5222_v1, %v1268_v26 }
 0x17f   :  { %v4447_v15 = vpop.f32.mrf.mxu0 }
 0x180   :  { %v5149_v34 = vadd.f32 %v645_v27, %v574_v31 }
 0x185   :  { %v651_v40 = vpop.permute.xlu1 %650 }
 0x186   :  { %v653_v43 = vsel %vm652_vm15, %v651_v40, 0  ;;  %v1270_v40 = vand.u32 4294901760, %v1269_v30 }
 0x187   :  { %v5164_v45 = vand.u32 4294901760, %v653_v43 }
 0x189   :  { %v726_v50 = vsub.f32 %v653_v43, %v5164_v45  ;;  %4461 = vmatmul.mubr.f32.vlgmr.msra.gmra.mxu1 %v5164_v45 }
 0x18a   :  { %4469 = vmatpush3.msra.mxu1 %v5127_v51  ;;  %4470 = vmatprep.mubr.msk.f32.mxu1 %vm5033_vm3, %v5032_v20 }
 0x18b   :  { %v727_v58 = vand.u32 4294901760, %v726_v50  ;;  %4478 = vmatprep.subr.mxu1 %v5032_v20 }
 0x18d   :  { %v728_v0 = vsub.f32 %v726_v50, %v727_v58  ;;  %4471 = vmatmul.mubr.f32.vlgmr.msra.gmra.mxu1 %v727_v58 }
 0x18e   :  { %4479 = vmatpush3.msra.mxu1 %v5127_v51  ;;  %4480 = vmatprep.mubr.msk.f32.mxu1 %vm5033_vm3, %v5032_v20  ;;  %v1247_v51 = vand.u32 4294901760, %v5189_v62 }
 0x18f   :  { %v729_v7 = vand.u32 4294901760, %v728_v0  ;;  %4502 = vmatprep.subr.mxu1 %v5032_v20 }
 0x190   :  { %v1248_v3 = vsub.f32 %v5189_v62, %v1247_v51 }
 0x191   :  { %4456 = vmatmul.mubr.f32.vlgmr.msra.gmra.mxu0 %v729_v7  ;;  %4481 = vmatmul.mubr.f32.vlgmr.msra.gmra.mxu1 %v5164_v45 }
 0x192   :  { %v158_v14 = vpop.permute.xlu1 %157  ;;  %4464 = vmatpush3.msra.mxu0 %v5130_v54  ;;  %4465 = vmatprep.mubr.msk.f32.mxu0 %vm5033_vm3, %v5032_v20  ;;  %v1249_v11 = vand.u32 4294901760, %v1248_v3  ;;  %v1262_v54 = vsub.f32 %v5211_v12, %v1261_v22 }
 0x193   :  { %4473 = vmatprep.subr.mxu0 %v5032_v20  ;;  %4503 = vmatpush3.msra.mxu1 %v1221_v8  ;;  %vm159_vm2 = vcmp.eq.s32.totalorder %v142_v18, %v158_v14 }
 0x194   :  { %4504 = vmatprep.subr.mxu1 %v5032_v20  ;;  %4518 = vmatprep.mubr.msk.f32.mxu1 %vm5033_vm3, %v5032_v20  ;;  %v4204_v31 = vsel %vm159_vm2, 1.0, %v5032_v20  ;;  %v1263_v38 = vand.u32 4294901760, %v1262_v54 }
 0x195   :  { %4466 = vmatmul.mubr.f32.vlgmr.msra.gmra.mxu0 %v726_v50  ;;  %4505 = vmatpush3.msra.mxu1 %v1228_v13 }
 0x196   :  { %v152_v23 = vpop.permute.xlu1 %151  ;;  %4474 = vmatpush3.msra.mxu0 %v768_v55  ;;  %4475 = vmatprep.mubr.msk.f32.mxu0 %vm5033_vm3, %v5032_v20  ;;  %v4203_v55 = vsel %vm146_vm0, 1.0, %v5032_v20  ;;  %vm4179_vm0 = vcmask 580984  }
 0x197   :  { %4506 = vmatprep.subr.mxu1 %v5032_v20  ;;  %4483 = vmatprep.subr.mxu0 %v5032_v20  ;;  %v154_v32 = vmul.f32 %v4203_v55, %v152_v23 }
 0x198   :  { %v165_v27 = vpop.permute.xlu0 %164  ;;  %4507 = vmatpush3.msra.mxu1 %v1235_v21 }
 0x199   :  { %4476 = vmatmul.mubr.f32.vlgmr.msra.gmra.mxu0 %v5164_v45  ;;  %4508 = vmatprep.subr.mxu1 %v5032_v20  ;;  %v167_v15 = vmul.f32 %v4204_v31, %v165_v27 }
 0x19a   :  { %v172_v28 = vpop.permute.xlu1 %171  ;;  %4509 = vmatpush3.msra.mxu1 %v1242_v24  ;;  %4484 = vmatpush3.msra.mxu0 %v5147_v33 }
 0x19b   :  { %4510 = vmatprep.subr.mxu1 %v5032_v20  ;;  %4485 = vmatprep.subr.mxu0 %v5032_v20  ;;  %vm173_vm4 = vcmp.eq.s32.totalorder %v142_v18, %v172_v28  ;;  %v168_v45 = vadd.f32 %v167_v15, %v154_v32 }
 0x19c   :  { %4511 = vmatpush3.msra.mxu1 %v1249_v11  ;;  %4486 = vmatpush3.msra.mxu0 %v5151_v35  ;;  %v4205_v42 = vsel %vm173_vm4, 1.0, %v5032_v20 }
 0x19d   :  { %v186_v36 = vpop.permute.xlu0 %185  ;;  %4512 = vmatprep.subr.mxu1 %v5032_v20  ;;  %4487 = vmatprep.subr.mxu0 %v5032_v20 }
 0x19e   :  { %vm187_vm5 = vcmp.eq.s32.totalorder %v142_v18, %v186_v36  ;;  %4513 = vmatpush3.msra.mxu1 %v1256_v29  ;;  %4488 = vmatpush3.msra.mxu0 %v5156_v39 }
 0x19f   :  { %v179_v43 = vpop.permute.xlu1 %178  ;;  %4514 = vmatprep.subr.mxu1 %v5032_v20  ;;  %4489 = vmatprep.subr.mxu0 %v5032_v20  ;;  %v4206_v50 = vsel %vm187_vm5, 1.0, %v5032_v20 }
 0x1a0   :  { %v181_v47 = vmul.f32 %v4205_v42, %v179_v43  ;;  %4515 = vmatpush3.msra.mxu1 %v1263_v38  ;;  %4490 = vmatpush3.msra.mxu0 %v5162_v44 }
 0x1a1   :  { %4516 = vmatprep.subr.mxu1 %v5032_v20  ;;  %4491 = vmatprep.subr.mxu0 %v5032_v20 }
 0x1a2   :  { %v182_v53 = vadd.f32 %v181_v47, %v168_v45  ;;  %4517 = vmatpush3.msra.mxu1 %v1270_v40  ;;  %4492 = vmatpush3.msra.mxu0 %v5170_v49 }
 0x1a3   :  { %4540 = vmatprep.subr.mxu1 %v5032_v20  ;;  %4493 = vmatprep.subr.mxu0 %v5032_v20 }
 0x1a4   :  { %v190_v58 = vadd.f32 %v4206_v50, %v182_v53  ;;  %4494 = vmatpush3.msra.mxu0 %v5181_v57  ;;  %4499 = vmatprep.mubr.msk.f32.mxu0 %vm5033_vm3, %v5032_v20 }
 0x1a5   :  { %4495 = vmatprep.subr.mxu0 %v5032_v20 }
 0x1a6   :  { %v1115_v59 = vsel %vm1113_vm6, %v190_v58, 0  ;;  %4496 = vmatpush3.msra.mxu0 %v5191_v63 }
 0x1a7   :  { %v5274_v60 = vand.u32 4294901760, %v1115_v59  ;;  %4497 = vmatprep.subr.mxu0 %v5032_v20 }
 0x1a8   :  { %4498 = vmatpush3.msra.mxu0 %v5203_v6 }
 0x1a9   :  { %v1191_v0 = vsub.f32 %v1115_v59, %v5274_v60  ;;  %4519 = vmatmul.mubr.f32.vlgmr.msra.gmra.mxu1 %v5274_v60  ;;  %4521 = vmatprep.subr.mxu0 %v5032_v20 }
 0x1aa   :  { %4541 = vmatpush3.msra.mxu1 %v5147_v33  ;;  %4556 = vmatprep.mubr.msk.f32.mxu1 %vm5033_vm3, %v5032_v20 }
 0x1ab   :  { %4542 = vmatprep.subr.mxu1 %v5032_v20  ;;  %v1192_v2 = vand.u32 4294901760, %v1191_v0 }
 0x1ac   :  { %4543 = vmatpush3.msra.mxu1 %v5151_v35 }
 0x1ad   :  { %4544 = vmatprep.subr.mxu1 %v5032_v20  ;;  %v1193_v7 = vsub.f32 %v1191_v0, %v1192_v2 }
 0x1ae   :  { %4545 = vmatpush3.msra.mxu1 %v5156_v39 }
 0x1af   :  { %4546 = vmatprep.subr.mxu1 %v5032_v20  ;;  %v1194_v8 = vand.u32 4294901760, %v1193_v7 }
 0x1b0   :  { %4547 = vmatpush3.msra.mxu1 %v5162_v44 }
 0x1b1   :  { %4548 = vmatprep.subr.mxu1 %v5032_v20  ;;  %4500 = vmatmul.mubr.f32.vlgmr.msra.gmra.mxu0 %v1194_v8 }
 0x1b2   :  { %4522 = vmatpush3.msra.mxu0 %v5154_v37  ;;  %4549 = vmatpush3.msra.mxu1 %v5170_v49  ;;  %v1664_v37 = vld [vmem:[#allocation5 + $0x60] sm:$0xff] }
 0x1b3   :  { %4523 = vmatprep.subr.mxu0 %v5032_v20  ;;  %4550 = vmatprep.subr.mxu1 %v5032_v20 }
 0x1b4   :  { %4524 = vmatpush3.msra.mxu0 %v5159_v41  ;;  %4551 = vmatpush3.msra.mxu1 %v5181_v57  ;;  %v5372_v41 = vand.u32 4294901760, %v1664_v37 }
 0x1b5   :  { %4525 = vmatprep.subr.mxu0 %v5032_v20  ;;  %4552 = vmatprep.subr.mxu1 %v5032_v20 }
 0x1b6   :  { %4526 = vmatpush3.msra.mxu0 %v5168_v48  ;;  %4553 = vmatpush3.msra.mxu1 %v5191_v63  ;;  %v5378_v48 = vsub.f32 %v1664_v37, %v5372_v41 }
 0x1b7   :  { %4527 = vmatprep.subr.mxu0 %v5032_v20  ;;  %4554 = vmatprep.subr.mxu1 %v5032_v20 }
 0x1b8   :  { %4528 = vmatpush3.msra.mxu0 %v5179_v56  ;;  %4555 = vmatpush3.msra.mxu1 %v5203_v6 }
 0x1b9   :  { %4529 = vmatprep.subr.mxu0 %v5032_v20  ;;  %4557 = vmatmul.mubr.f32.vlgmr.msra.gmra.mxu1 %v1192_v2 }
 0x1ba   :  { %4578 = vmatprep.subr.mxu1 %v5032_v20  ;;  %4530 = vmatpush3.msra.mxu0 %v5189_v62 }
 0x1bb   :  { %4579 = vmatpush3.msra.mxu1 %v5147_v33  ;;  %4531 = vmatprep.subr.mxu0 %v5032_v20  ;;  %v1665_v33 = vld [vmem:[#allocation5 + $0x68] sm:$0xff] }
 0x1bc   :  { %4580 = vmatprep.subr.mxu1 %v5032_v20  ;;  %4532 = vmatpush3.msra.mxu0 %v5201_v5 }
 0x1bd   :  { %4581 = vmatpush3.msra.mxu1 %v5151_v35  ;;  %4533 = vmatprep.subr.mxu0 %v5032_v20  ;;  %v5367_v35 = vand.u32 4294901760, %v1665_v33 }
 0x1be   :  { %4582 = vmatprep.subr.mxu1 %v5032_v20  ;;  %4534 = vmatpush3.msra.mxu0 %v5211_v12 }
 0x1bf   :  { %4583 = vmatpush3.msra.mxu1 %v5156_v39  ;;  %4535 = vmatprep.subr.mxu0 %v5032_v20  ;;  %v5370_v39 = vsub.f32 %v1665_v33, %v5367_v35 }
 0x1c0   :  { %4584 = vmatprep.subr.mxu1 %v5032_v20  ;;  %4536 = vmatpush3.msra.mxu0 %v5222_v1 }
 0x1c1   :  { %4537 = vmatprep.mubr.msk.f32.mxu0 %vm5033_vm3, %v5032_v20  ;;  %4585 = vmatpush3.msra.mxu1 %v5162_v44  ;;  %v1663_v44 = vld [vmem:[#allocation5 + $0x58] sm:$0xff] }
 0x1c2   :  { %4538 = vmatmul.mubr.f32.vlgmr.msra.gmra.mxu0 %v1191_v0  ;;  %4559 = vmatprep.subr.mxu0 %v5032_v20  ;;  %v4207_v0 = vld [vmem:[#allocation7 + $0x2] ss:$0 sm:$0xff] }
 0x1c3   :  { %4586 = vmatprep.subr.mxu1 %v5032_v20  ;;  %4560 = vmatpush3.msra.mxu0 %v1219_v46  ;;  %v1781_v46 = vand.u32 4294901760, %v5370_v39 }
 0x1c4   :  { %4587 = vmatpush3.msra.mxu1 %v5170_v49  ;;  %4561 = vmatprep.subr.mxu0 %v5032_v20  ;;  %v5380_v49 = vand.u32 4294901760, %v1663_v44 }
 0x1c5   :  { %4588 = vmatprep.subr.mxu1 %v5032_v20  ;;  %4562 = vmatpush3.msra.mxu0 %v1226_v52  ;;  %v1662_v52 = vld [vmem:[#allocation5 + $0x50] sm:$0xff]  ;;  %v1782_v56 = vsub.f32 %v5370_v39, %v1781_v46 }
 0x1c6   :  { %4589 = vmatpush3.msra.mxu1 %v5181_v57  ;;  %4563 = vmatprep.subr.mxu0 %v5032_v20  ;;  %v1788_v57 = vand.u32 4294901760, %v5378_v48  ;;  %v5391_v62 = vand.u32 4294901760, %v1662_v52 }
 0x1c7   :  { %4590 = vmatprep.subr.mxu1 %v5032_v20  ;;  %4564 = vmatpush3.msra.mxu0 %v1233_v61  ;;  %v5389_v61 = vsub.f32 %v1663_v44, %v5380_v49 }
 0x1c8   :  { %4591 = vmatpush3.msra.mxu1 %v5191_v63  ;;  %4565 = vmatprep.subr.mxu0 %v5032_v20  ;;  %v1783_v63 = vand.u32 4294901760, %v1782_v56 }
 0x1c9   :  { %4592 = vmatprep.subr.mxu1 %v5032_v20  ;;  %4566 = vmatpush3.msra.mxu0 %v1240_v4  ;;  %v1789_v4 = vsub.f32 %v5378_v48, %v1788_v57  ;;  %v1795_v5 = vand.u32 4294901760, %v5389_v61 }
 0x1ca   :  { %4593 = vmatpush3.msra.mxu1 %v5203_v6  ;;  %4594 = vmatprep.mubr.msk.f32.mxu1 %vm5033_vm3, %v5032_v20  ;;  %v5400_v6 = vsub.f32 %v1662_v52, %v5391_v62 }
 0x1cb   :  { %4567 = vmatprep.subr.mxu0 %v5032_v20  ;;  %4595 = vmatmul.mubr.f32.vlgmr.msra.gmra.mxu1 %v5274_v60  ;;  %v1790_v9 = vand.u32 4294901760, %v1789_v4  ;;  %v1796_v10 = vsub.f32 %v5389_v61, %v1795_v5  ;;  %v2161_v4 = vld [vmem:[#allocation5 + $0x70] sm:$0xff] }
 0x1cc   :  { %4568 = vmatpush3.msra.mxu0 %v1247_v51  ;;  %4575 = vmatprep.mubr.msk.f32.mxu0 %vm5033_vm3, %v5032_v20  ;;  %v1802_v51 = vand.u32 4294901760, %v5400_v6 }
 0x1cd   :  { %4569 = vmatprep.subr.mxu0 %v5032_v20  ;;  %4608 = vmatprep.subr.mxu1 %v5032_v20  ;;  %v1797_v12 = vand.u32 4294901760, %v1796_v10  ;;  %v5489_v10 = vand.u32 4294901760, %v2161_v4 }
 0x1ce   :  { %4570 = vmatpush3.msra.mxu0 %v1254_v19  ;;  %4616 = vmatprep.mubr.msk.f32.mxu1 %vm5033_vm3, %v5032_v20  ;;  %v1803_v13 = vsub.f32 %v5400_v6, %v1802_v51 }
 0x1cf   :  { %4571 = vmatprep.subr.mxu0 %v5032_v20  ;;  %4609 = vmatpush3.msra.mxu1 %v1783_v63 }
 0x1d0   :  { %4572 = vmatpush3.msra.mxu0 %v1261_v22  ;;  %4610 = vmatprep.subr.mxu1 %v5032_v20  ;;  %v1804_v14 = vand.u32 4294901760, %v1803_v13 }
 0x1d1   :  { %4573 = vmatprep.subr.mxu0 %v5032_v20  ;;  %4611 = vmatpush3.msra.mxu1 %v1790_v9 }
 0x1d2   :  { %4574 = vmatpush3.msra.mxu0 %v1268_v26  ;;  %4612 = vmatprep.subr.mxu1 %v5032_v20 }
 0x1d3   :  { %4576 = vmatmul.mubr.f32.vlgmr.msra.gmra.mxu0 %v5274_v60  ;;  %4597 = vmatprep.subr.mxu0 %v5032_v20 }
 0x1d4   :  { %4605 = vmatprep.mubr.msk.f32.mxu0 %vm5033_vm3, %v5032_v20  ;;  %4598 = vmatpush3.msra.mxu0 %v5367_v35 }
 0x1d5   :  { %4599 = vmatprep.subr.mxu0 %v5032_v20  ;;  %4613 = vmatpush3.msra.mxu1 %v1797_v12 }
 0x1d6   :  { %4600 = vmatpush3.msra.mxu0 %v5372_v41  ;;  %4614 = vmatprep.subr.mxu1 %v5032_v20 }
 0x1d7   :  { %4601 = vmatprep.subr.mxu0 %v5032_v20  ;;  %4615 = vmatpush3.msra.mxu1 %v1804_v14  ;;  %v5498_v14 = vsub.f32 %v2161_v4, %v5489_v10 }
 0x1d8   :  { %4602 = vmatpush3.msra.mxu0 %v5380_v49  ;;  %4630 = vmatprep.subr.mxu1 %v5032_v20 }
 0x1d9   :  { %4603 = vmatprep.subr.mxu0 %v5032_v20 }
 0x1da   :  { %4604 = vmatpush3.msra.mxu0 %v5391_v62 }
 0x1db   :  { %4619 = vmatprep.subr.mxu0 %v5032_v20 }
 0x249   :  { %v807_v16 = vpop.f32.mrf.mxu1 }
 0x24b   :  { %v4462_v17 = vpop.f32.mrf.mxu1 }
 0x24d   :  { %v955_v19 = vpop.f32.mrf.mxu1 }
 0x24f   :  { %v4472_v1 = vpop.f32.mrf.mxu1 }
 0x251   :  { %v731_v18 = vpop.f32.mrf.mxu0  ;;  %v1101_v21 = vpop.f32.mrf.mxu1 }
 0x252   :  { %v732_v3 = vadd.f32 %v731_v18, %v5149_v34 }
 0x253   :  { %v4457_v22 = vpop.f32.mrf.mxu0  ;;  %v4482_v23 = vpop.f32.mrf.mxu1 }
 0x254   :  { %v808_v24 = vadd.f32 %v807_v16, %v732_v3  ;;  %v5511_v3 = vld [vmem:[#allocation8] sm:$0xff] }
 0x255   :  { %v881_v25 = vpop.f32.mrf.mxu0 }
 0x256   :  { %v882_v26 = vadd.f32 %v881_v25, %v808_v24 }
 0x257   :  { %v4467_v27 = vpop.f32.mrf.mxu0 }
 0x258   :  { %v956_v11 = vadd.f32 %v955_v19, %v882_v26  ;;  %v2300_v19 = vand.u32 4294901760, %v5498_v14 }
 0x259   :  { %v1029_v54 = vpop.f32.mrf.mxu0 }
 0x25a   :  { %v1030_v55 = vadd.f32 %v1029_v54, %v956_v11  ;;  %v2301_v18 = vsub.f32 %v5498_v14, %v2300_v19  ;;  %v4208_v11 = vld [vmem:[#allocation7 + $0x3] ss:$0 sm:$0xff] }
 0x25b   :  { %v4477_v28 = vpop.f32.mrf.mxu0 }
 0x25c   :  { %v1102_v29 = vadd.f32 %v1101_v21, %v1030_v55  ;;  %v2302_v21 = vand.u32 4294901760, %v2301_v18 }
 0x269   :  { %v1307_v30 = vpop.f32.mrf.mxu1 }
 0x26b   :  { %v4520_v31 = vpop.f32.mrf.mxu1 }
 0x271   :  { %v1196_v32 = vpop.f32.mrf.mxu0 }
 0x272   :  { %v1308_v43 = vadd.f32 %v1307_v30, %v1196_v32 }
 0x273   :  { %v4501_v15 = vpop.f32.mrf.mxu0 }
 0x279   :  { %v1476_v36 = vpop.f32.mrf.mxu1 }
 0x27b   :  { %v4558_v38 = vpop.f32.mrf.mxu1 }
 0x282   :  { %v1395_v40 = vpop.f32.mrf.mxu0 }
 0x283   :  { %v1396_v47 = vadd.f32 %v1395_v40, %v1308_v43 }
 0x284   :  { %v4539_v42 = vpop.f32.mrf.mxu0 }
 0x285   :  { %v1477_v50 = vadd.f32 %v1476_v36, %v1396_v47 }
 0x28b   :  { %v1650_v34 = vpop.f32.mrf.mxu1 }
 0x28d   :  { %v4596_v45 = vpop.f32.mrf.mxu1 }
 0x293   :  { %v1571_v53 = vpop.f32.mrf.mxu0 }
 0x294   :  { %v1572_v58 = vadd.f32 %v1571_v53, %v1477_v50 }
 0x295   :  { %v4577_v59 = vpop.f32.mrf.mxu0 }
 0x296   :  { %v1651_v60 = vadd.f32 %v1650_v34, %v1572_v58  ;;  %v2661_v58 = vld [vmem:[#allocation5 + $0xa0] sm:$0x7f] }
 0x297   :  { %v2672_v59 = vsel %vm199_vm1, %v2661_v58, 0  ;;  %vm2667_vm1 = vcmask 187392  }
 0x298   :  { %v1654_v2 = vadd.f32 %v1651_v60, %v1102_v29  ;;  %v5577_v60 = vand.u32 4294901760, %v2672_v59 }
 0x29a   :  { %v1660_v7 = vadd.f32 %v4207_v0, %v1654_v2  ;;  %v5588_v0 = vsub.f32 %v2672_v59, %v5577_v60  ;;  %v2660_v2 = vld [vmem:[#allocation5 + $0x98] sm:$0xff] }
 0x29c   :  { %v1661_v8 = vmax.f32 %v1660_v7, 0.0  ;;  %v5590_v7 = vand.u32 4294901760, %v2660_v2 }
 0x29e   :  { %v1673_v33 = vsel %vm1671_vm7, %v1661_v8, 0  ;;  %v2659_v8 = vld [vmem:[#allocation5 + $0x90] sm:$0xff] }
 0x29f   :  { %v1744_v37 = vand.u32 4294901760, %v1673_v33 }
 0x2a1   :  { %v1745_v44 = vsub.f32 %v1673_v33, %v1744_v37  ;;  %4617 = vmatmul.mubr.f32.vlgmr.msra.gmra.mxu1 %v1744_v37  ;;  %v2781_v33 = vand.u32 4294901760, %v5588_v0 }
 0x2a2   :  { %4631 = vmatpush3.msra.mxu1 %v5367_v35  ;;  %4638 = vmatprep.mubr.msk.f32.mxu1 %vm5033_vm3, %v5032_v20 }
 0x2a3   :  { %4632 = vmatprep.subr.mxu1 %v5032_v20  ;;  %v1746_v52 = vand.u32 4294901760, %v1745_v44 }
 0x2a4   :  { %4633 = vmatpush3.msra.mxu1 %v5372_v41 }
 0x2a5   :  { %4634 = vmatprep.subr.mxu1 %v5032_v20  ;;  %v1747_v56 = vsub.f32 %v1745_v44, %v1746_v52 }
 0x2a6   :  { %4635 = vmatpush3.msra.mxu1 %v5380_v49 }
 0x2a7   :  { %4636 = vmatprep.subr.mxu1 %v5032_v20  ;;  %v1748_v63 = vand.u32 4294901760, %v1747_v56 }
 0x2a8   :  { %4637 = vmatpush3.msra.mxu1 %v5391_v62 }
 0x2a9   :  { %4639 = vmatmul.mubr.f32.vlgmr.msra.gmra.mxu1 %v1746_v52  ;;  %4652 = vmatprep.subr.mxu1 %v5032_v20  ;;  %v2782_v52 = vsub.f32 %v5588_v0, %v2781_v33 }
 0x2aa   :  { %4606 = vmatmul.mubr.f32.vlgmr.msra.gmra.mxu0 %v1748_v63  ;;  %4653 = vmatpush3.msra.mxu1 %v5367_v35  ;;  %v2164_v35 = vld [vmem:[#allocation5 + $0x88] sm:$0xff] }
 0x2ab   :  { %4620 = vmatpush3.msra.mxu0 %v5370_v39  ;;  %4654 = vmatprep.subr.mxu1 %v5032_v20  ;;  %v5465_v39 = vand.u32 4294901760, %v2164_v35 }
 0x2ac   :  { %4621 = vmatprep.subr.mxu0 %v5032_v20  ;;  %4655 = vmatpush3.msra.mxu1 %v5372_v41  ;;  %v2163_v41 = vld [vmem:[#allocation5 + $0x80] sm:$0xff] }
 0x2ad   :  { %4622 = vmatpush3.msra.mxu0 %v5378_v48  ;;  %4656 = vmatprep.subr.mxu1 %v5032_v20  ;;  %v5470_v48 = vand.u32 4294901760, %v2163_v41 }
 0x2ae   :  { %4623 = vmatprep.subr.mxu0 %v5032_v20  ;;  %4657 = vmatpush3.msra.mxu1 %v5380_v49  ;;  %v2162_v49 = vld [vmem:[#allocation5 + $0x78] sm:$0xff] }
 0x2af   :  { %4624 = vmatpush3.msra.mxu0 %v5389_v61  ;;  %4658 = vmatprep.subr.mxu1 %v5032_v20  ;;  %v5476_v61 = vsub.f32 %v2163_v41, %v5470_v48 }
 0x2b0   :  { %4625 = vmatprep.subr.mxu0 %v5032_v20  ;;  %4627 = vmatprep.mubr.msk.f32.mxu0 %vm5033_vm3, %v5032_v20 }
 0x2b1   :  { %4626 = vmatpush3.msra.mxu0 %v5400_v6  ;;  %4659 = vmatpush3.msra.mxu1 %v5391_v62  ;;  %v5478_v62 = vand.u32 4294901760, %v2162_v49  ;;  %v2286_v6 = vand.u32 4294901760, %v5476_v61 }
 0x2b2   :  { %4660 = vmatprep.mubr.msk.f32.mxu1 %vm5033_vm3, %v5032_v20  ;;  %4628 = vmatmul.mubr.f32.vlgmr.msra.gmra.mxu0 %v1745_v44  ;;  %v5596_v44 = vand.u32 4294901760, %v2659_v8 }
 0x2b3   :  { %4641 = vmatprep.subr.mxu0 %v5032_v20  ;;  %4661 = vmatmul.mubr.f32.vlgmr.msra.gmra.mxu1 %v1744_v37  ;;  %v5487_v9 = vsub.f32 %v2162_v49, %v5478_v62  ;;  %v2287_v12 = vsub.f32 %v5476_v61, %v2286_v6 }
 0x2b4   :  { %4642 = vmatpush3.msra.mxu0 %v1781_v46  ;;  %4649 = vmatprep.mubr.msk.f32.mxu0 %vm5033_vm3, %v5032_v20  ;;  %v5468_v46 = vsub.f32 %v2164_v35, %v5465_v39  ;;  %v5605_v63 = vsub.f32 %v2659_v8, %v5596_v44  ;;  %v2783_v35 = vand.u32 4294901760, %v2782_v52 }
 0x2b5   :  { %4643 = vmatprep.subr.mxu0 %v5032_v20  ;;  %4674 = vmatprep.subr.mxu1 %v5032_v20  ;;  %v2293_v13 = vand.u32 4294901760, %v5487_v9  ;;  %v2288_v16 = vand.u32 4294901760, %v2287_v12 }
 0x2b6   :  { %4644 = vmatpush3.msra.mxu0 %v1788_v57  ;;  %4682 = vmatprep.mubr.msk.f32.mxu1 %vm5033_vm3, %v5032_v20  ;;  %v2279_v57 = vand.u32 4294901760, %v5468_v46  ;;  %v2795_v41 = vand.u32 4294901760, %v5605_v63 }
 0x2b7   :  { %4645 = vmatprep.subr.mxu0 %v5032_v20  ;;  %v2294_v17 = vsub.f32 %v5487_v9, %v2293_v13 }
 0x2b8   :  { %4646 = vmatpush3.msra.mxu0 %v1795_v5  ;;  %v2280_v5 = vsub.f32 %v5468_v46, %v2279_v57 }
 0x2b9   :  { %4647 = vmatprep.subr.mxu0 %v5032_v20  ;;  %v2295_v1 = vand.u32 4294901760, %v2294_v17 }
 0x2ba   :  { %4648 = vmatpush3.msra.mxu0 %v1802_v51  ;;  %v2281_v51 = vand.u32 4294901760, %v2280_v5 }
 0x2bb   :  { %4650 = vmatmul.mubr.f32.vlgmr.msra.gmra.mxu0 %v1744_v37  ;;  %4663 = vmatprep.subr.mxu0 %v5032_v20  ;;  %v5594_v37 = vsub.f32 %v2660_v2, %v5590_v7 }
 0x2bc   :  { %4671 = vmatprep.mubr.msk.f32.mxu0 %vm5033_vm3, %v5032_v20  ;;  %4664 = vmatpush3.msra.mxu0 %v5465_v39 }
 0x2bd   :  { %4665 = vmatprep.subr.mxu0 %v5032_v20  ;;  %4675 = vmatpush3.msra.mxu1 %v2281_v51  ;;  %v2788_v56 = vand.u32 4294901760, %v5594_v37 }
 0x2be   :  { %4666 = vmatpush3.msra.mxu0 %v5470_v48  ;;  %4676 = vmatprep.subr.mxu1 %v5032_v20 }
 0x2bf   :  { %4667 = vmatprep.subr.mxu0 %v5032_v20  ;;  %4677 = vmatpush3.msra.mxu1 %v2288_v16 }
 0x2c0   :  { %4668 = vmatpush3.msra.mxu0 %v5478_v62  ;;  %4678 = vmatprep.subr.mxu1 %v5032_v20 }
 0x2c1   :  { %4669 = vmatprep.subr.mxu0 %v5032_v20  ;;  %4679 = vmatpush3.msra.mxu1 %v2295_v1 }
 0x2c2   :  { %4670 = vmatpush3.msra.mxu0 %v5489_v10  ;;  %4680 = vmatprep.subr.mxu1 %v5511_v3 }
 0x2c3   :  { %4685 = vmatprep.subr.mxu0 %v5032_v20  ;;  %4681 = vmatpush3.msra.mxu1 %v2302_v21 }
 0x2c4   :  { %4696 = vmatprep.subr.mxu1 %v5511_v3 }
 0x361   :  { %v1841_v22 = vpop.f32.mrf.mxu1 }
 0x363   :  { %v4618_v23 = vpop.f32.mrf.mxu1 }
 0x369   :  { %v1998_v24 = vpop.f32.mrf.mxu1 }
 0x36a   :  { %v1750_v25 = vpop.f32.mrf.mxu0 }
 0x36b   :  { %v4640_v26 = vpop.f32.mrf.mxu1  ;;  %v1751_v54 = vadd.f32 %v4208_v11, %v1750_v25 }
 0x36c   :  { %v4607_v27 = vpop.f32.mrf.mxu0 }
 0x36d   :  { %v1842_v20 = vadd.f32 %v1841_v22, %v1751_v54 }
 0x372   :  { %v1921_v55 = vpop.f32.mrf.mxu0 }
 0x373   :  { %v2156_v28 = vpop.f32.mrf.mxu1  ;;  %v1922_v31 = vadd.f32 %v1921_v55, %v1842_v20  ;;  %v3148_v55 = vld [vmem:[#allocation5 + $0xb0] sm:$0x1f] }
 0x374   :  { %v4629_v29 = vpop.f32.mrf.mxu0 }
 0x375   :  { %v4662_v30 = vpop.f32.mrf.mxu1  ;;  %v1999_v32 = vadd.f32 %v1998_v24, %v1922_v31  ;;  %v3147_v29 = vld [vmem:[#allocation5 + $0xa8] sm:$0xff] }
 0x376   :  { %v5663_v31 = vand.u32 4294901760, %v3147_v29 }
 0x37b   :  { %v2081_v15 = vpop.f32.mrf.mxu0 }
 0x37c   :  { %v2082_v36 = vadd.f32 %v2081_v15, %v1999_v32  ;;  %v5669_v15 = vsub.f32 %v3147_v29, %v5663_v31 }
 0x37d   :  { %v4651_v38 = vpop.f32.mrf.mxu0 }
 0x37e   :  { %v2157_v40 = vadd.f32 %v2156_v28, %v2082_v36  ;;  %v3160_v28 = vsel %vm3158_vm8, %v3148_v55, 0  ;;  %v3277_v38 = vand.u32 4294901760, %v5669_v15 }
 0x37f   :  { %v5658_v20 = vand.u32 4294901760, %v3160_v28 }
 0x380   :  { %v2160_v42 = vmax.f32 %v2157_v40, 0.0 }
 0x381   :  { %v5661_v30 = vsub.f32 %v3160_v28, %v5658_v20 }
 0x382   :  { %v2171_v34 = vsel %vm1671_vm7, %v2160_v42, 0  ;;  %v3278_v42 = vsub.f32 %v5669_v15, %v3277_v38 }
 0x383   :  { %v5516_v43 = vand.u32 4294901760, %v2171_v34  ;;  %v3270_v32 = vand.u32 4294901760, %v5661_v30 }
 0x385   :  { %v5519_v45 = vsub.f32 %v2171_v34, %v5516_v43  ;;  %4683 = vmatmul.mubr.f32.vlgmr.msra.gmra.mxu1 %v5516_v43  ;;  %v3271_v36 = vsub.f32 %v5661_v30, %v3270_v32  ;;  %v3279_v34 = vand.u32 4294901760, %v3278_v42 }
 0x386   :  { %4697 = vmatpush3.msra.mxu1 %v5465_v39  ;;  %4704 = vmatprep.mubr.msk.f32.mxu1 %vm5033_vm3, %v5511_v3 }
 0x387   :  { %4698 = vmatprep.subr.mxu1 %v5511_v3  ;;  %v5527_v47 = vand.u32 4294901760, %v5519_v45  ;;  %v3272_v40 = vand.u32 4294901760, %v3271_v36 }
 0x388   :  { %4699 = vmatpush3.msra.mxu1 %v5470_v48 }
 0x389   :  { %4700 = vmatprep.subr.mxu1 %v5511_v3  ;;  %v2245_v50 = vsub.f32 %v5519_v45, %v5527_v47 }
 0x38a   :  { %4701 = vmatpush3.msra.mxu1 %v5478_v62 }
 0x38b   :  { %4702 = vmatprep.subr.mxu1 %v5511_v3  ;;  %v5535_v53 = vand.u32 4294901760, %v2245_v50 }
 0x38c   :  { %4703 = vmatpush3.msra.mxu1 %v5489_v10 }
 0x38d   :  { %4705 = vmatmul.mubr.f32.vlgmr.msra.gmra.mxu1 %v5527_v47  ;;  %4718 = vmatprep.subr.mxu1 %v5511_v3 }
 0x38e   :  { %4672 = vmatmul.mubr.f32.vlgmr.msra.gmra.mxu0 %v5535_v53  ;;  %4719 = vmatpush3.msra.mxu1 %v5465_v39  ;;  %v2789_v39 = vsub.f32 %v5594_v37, %v2788_v56 }
 0x38f   :  { %4686 = vmatpush3.msra.mxu0 %v5468_v46  ;;  %4720 = vmatprep.subr.mxu1 %v5511_v3 }
 0x390   :  { %4687 = vmatprep.subr.mxu0 %v5511_v3  ;;  %4721 = vmatpush3.msra.mxu1 %v5470_v48  ;;  %v2790_v46 = vand.u32 4294901760, %v2789_v39  ;;  %v2796_v48 = vsub.f32 %v5605_v63, %v2795_v41 }
 0x391   :  { %4688 = vmatpush3.msra.mxu0 %v5476_v61  ;;  %4722 = vmatprep.subr.mxu1 %v5511_v3 }
 0x392   :  { %4689 = vmatprep.subr.mxu0 %v5511_v3  ;;  %4723 = vmatpush3.msra.mxu1 %v5478_v62  ;;  %v2797_v49 = vand.u32 4294901760, %v2796_v48 }
 0x393   :  { %4690 = vmatpush3.msra.mxu0 %v5487_v9  ;;  %4724 = vmatprep.subr.mxu1 %v5511_v3  ;;  %v4209_v9 = vld [vmem:[#allocation7 + $0x4] ss:$0 sm:$0xff] }
 0x394   :  { %4691 = vmatprep.subr.mxu0 %v5511_v3  ;;  %4693 = vmatprep.mubr.msk.f32.mxu0 %vm5033_vm3, %v5511_v3 }
 0x395   :  { %4692 = vmatpush3.msra.mxu0 %v5498_v14  ;;  %4725 = vmatpush3.msra.mxu1 %v5489_v10 }
 0x396   :  { %4726 = vmatprep.mubr.msk.f32.mxu1 %vm5033_vm3, %v5511_v3  ;;  %4694 = vmatmul.mubr.f32.vlgmr.msra.gmra.mxu0 %v5519_v45 }
 0x397   :  { %4707 = vmatprep.subr.mxu0 %v5511_v3  ;;  %4727 = vmatmul.mubr.f32.vlgmr.msra.gmra.mxu1 %v5516_v43 }
 0x398   :  { %4708 = vmatpush3.msra.mxu0 %v2279_v57  ;;  %4715 = vmatprep.mubr.msk.f32.mxu0 %vm5033_vm3, %v5511_v3 }
 0x399   :  { %4709 = vmatprep.subr.mxu0 %v5511_v3  ;;  %4738 = vmatprep.subr.mxu1 %v5511_v3 }
 0x39a   :  { %4710 = vmatpush3.msra.mxu0 %v2286_v6  ;;  %4744 = vmatprep.mubr.msk.f32.mxu1 %vm5033_vm3, %v5511_v3 }
 0x39b   :  { %4711 = vmatprep.subr.mxu0 %v5511_v3  ;;  %4739 = vmatpush3.msra.mxu1 %v2783_v35  ;;  %v3624_v35 = vld [vmem:[#allocation5 + $0xd0] sm:$0xff] }
 0x39c   :  { %4712 = vmatpush3.msra.mxu0 %v2293_v13  ;;  %4740 = vmatprep.subr.mxu1 %v5511_v3  ;;  %v5682_v48 = vand.u32 4294901760, %v3624_v35 }
 0x39d   :  { %4713 = vmatprep.subr.mxu0 %v5511_v3  ;;  %4741 = vmatpush3.msra.mxu1 %v2790_v46 }
 0x39e   :  { %4714 = vmatpush3.msra.mxu0 %v2300_v19  ;;  %4742 = vmatprep.subr.mxu1 %v5511_v3 }
 0x39f   :  { %4716 = vmatmul.mubr.f32.vlgmr.msra.gmra.mxu0 %v5516_v43  ;;  %4729 = vmatprep.subr.mxu0 %v5511_v3 }
 0x3a0   :  { %4730 = vmatpush3.msra.mxu0 %v5577_v60  ;;  %4735 = vmatprep.mubr.msk.f32.mxu0 %vm5033_vm3, %v5511_v3 }
 0x3a1   :  { %4731 = vmatprep.subr.mxu0 %v5511_v3  ;;  %4743 = vmatpush3.msra.mxu1 %v2797_v49 }
 0x3a2   :  { %4732 = vmatpush3.msra.mxu0 %v5590_v7  ;;  %4756 = vmatprep.subr.mxu1 %v5511_v3 }
 0x3a3   :  { %4733 = vmatprep.subr.mxu0 %v5511_v3 }
 0x3a4   :  { %4734 = vmatpush3.msra.mxu0 %v5596_v44 }
 0x3a5   :  { %4747 = vmatprep.subr.mxu0 %v5511_v3 }
 0x445   :  { %v2339_v57 = vpop.f32.mrf.mxu1 }
 0x447   :  { %v4684_v61 = vpop.f32.mrf.mxu1 }
 0x44d   :  { %v2496_v62 = vpop.f32.mrf.mxu1 }
 0x44e   :  { %v2248_v4 = vpop.f32.mrf.mxu0 }
 0x44f   :  { %v4706_v5 = vpop.f32.mrf.mxu1  ;;  %v2249_v10 = vadd.f32 %v4209_v9, %v2248_v4 }
 0x450   :  { %v4673_v6 = vpop.f32.mrf.mxu0  ;;  %v3621_v5 = vld [vmem:[#allocation5 + $0xb8] sm:$0xff] }
 0x451   :  { %v2340_v13 = vadd.f32 %v2339_v57, %v2249_v10  ;;  %v3622_v57 = vld [vmem:[#allocation5 + $0xc0] sm:$0xff]  ;;  %v5687_v6 = vsub.f32 %v3624_v35, %v5682_v48 }
 0x452   :  { %v5689_v9 = vand.u32 4294901760, %v3622_v57 }
 0x456   :  { %v2419_v51 = vpop.f32.mrf.mxu0 }
 0x457   :  { %v2654_v12 = vpop.f32.mrf.mxu1  ;;  %v2420_v17 = vadd.f32 %v2419_v51, %v2340_v13 }
 0x458   :  { %v4695_v14 = vpop.f32.mrf.mxu0 }
 0x459   :  { %v4728_v16 = vpop.f32.mrf.mxu1  ;;  %v2497_v19 = vadd.f32 %v2496_v62, %v2420_v17  ;;  %v5698_v17 = vsub.f32 %v3622_v57, %v5689_v9 }
 0x45a   :  { %v3736_v16 = vand.u32 4294901760, %v5687_v6 }
 0x45f   :  { %v2579_v1 = vpop.f32.mrf.mxu0 }
 0x460   :  { %v2580_v18 = vadd.f32 %v2579_v1, %v2497_v19 }
 0x461   :  { %v4717_v21 = vpop.f32.mrf.mxu0 }
 0x462   :  { %v2655_v22 = vadd.f32 %v2654_v12, %v2580_v18  ;;  %v5694_v12 = vand.u32 4294901760, %v3621_v5 }
 0x464   :  { %v2658_v23 = vmax.f32 %v2655_v22, 0.0  ;;  %v5702_v18 = vsub.f32 %v3621_v5, %v5694_v12  ;;  %v3737_v22 = vsub.f32 %v5687_v6, %v3736_v16 }
 0x466   :  { %v2669_v24 = vsel %vm2667_vm1, %v2658_v23, 0  ;;  %v3750_v23 = vand.u32 4294901760, %v5698_v17 }
 0x467   :  { %v2742_v25 = vand.u32 4294901760, %v2669_v24 }
 0x469   :  { %v2743_v26 = vsub.f32 %v2669_v24, %v2742_v25  ;;  %4745 = vmatmul.mubr.f32.vlgmr.msra.gmra.mxu1 %v2742_v25 }
 0x46a   :  { %4757 = vmatpush3.msra.mxu1 %v5577_v60  ;;  %4762 = vmatprep.mubr.msk.f32.mxu1 %vm5033_vm3, %v5511_v3 }
 0x46b   :  { %4758 = vmatprep.subr.mxu1 %v5511_v3  ;;  %v2744_v27 = vand.u32 4294901760, %v2743_v26 }
 0x46c   :  { %4759 = vmatpush3.msra.mxu1 %v5590_v7 }
 0x46d   :  { %4760 = vmatprep.subr.mxu1 %v5511_v3  ;;  %v2745_v11 = vsub.f32 %v2743_v26, %v2744_v27 }
 0x46e   :  { %4761 = vmatpush3.msra.mxu1 %v5596_v44 }
 0x46f   :  { %4763 = vmatmul.mubr.f32.vlgmr.msra.gmra.mxu1 %v2744_v27  ;;  %4774 = vmatprep.subr.mxu1 %v5511_v3  ;;  %v2746_v54 = vand.u32 4294901760, %v2745_v11  ;;  %v3738_v11 = vand.u32 4294901760, %v3737_v22 }
 0x470   :  { %4775 = vmatpush3.msra.mxu1 %v5577_v60  ;;  %4780 = vmatprep.mubr.msk.f32.mxu1 %vm5033_vm3, %v5511_v3  ;;  %v4210_v60 = vld [vmem:[#allocation7 + $0x5] ss:$0 sm:$0xff] }
 0x471   :  { %4776 = vmatprep.subr.mxu1 %v5511_v3  ;;  %4736 = vmatmul.mubr.f32.vlgmr.msra.gmra.mxu0 %v2746_v54  ;;  %v3751_v54 = vsub.f32 %v5698_v17, %v3750_v23 }
 0x472   :  { %4748 = vmatpush3.msra.mxu0 %v5588_v0  ;;  %4777 = vmatpush3.msra.mxu1 %v5590_v7 }
 0x473   :  { %4749 = vmatprep.subr.mxu0 %v5511_v3  ;;  %4778 = vmatprep.subr.mxu1 %v5511_v3 }
 0x474   :  { %4750 = vmatpush3.msra.mxu0 %v5594_v37  ;;  %4779 = vmatpush3.msra.mxu1 %v5596_v44 }
 0x475   :  { %4751 = vmatprep.subr.mxu0 %v5511_v3  ;;  %4781 = vmatmul.mubr.f32.vlgmr.msra.gmra.mxu1 %v2742_v25 }
 0x476   :  { %4752 = vmatpush3.msra.mxu0 %v5605_v63  ;;  %4753 = vmatprep.mubr.msk.f32.mxu0 %vm5033_vm3, %v5511_v3 }
 0x477   :  { %4754 = vmatmul.mubr.f32.vlgmr.msra.gmra.mxu0 %v2743_v26  ;;  %4765 = vmatprep.subr.mxu0 %v5511_v3  ;;  %v3757_v26 = vand.u32 4294901760, %v5702_v18 }
 0x478   :  { %4766 = vmatpush3.msra.mxu0 %v2781_v33  ;;  %4771 = vmatprep.mubr.msk.f32.mxu0 %vm5033_vm3, %v5511_v3 }
 0x479   :  { %4767 = vmatprep.subr.mxu0 %v5511_v3  ;;  %4790 = vmatprep.subr.mxu1 %v5511_v3  ;;  %v3758_v28 = vsub.f32 %v5702_v18, %v3757_v26 }
 0x47a   :  { %4768 = vmatpush3.msra.mxu0 %v2788_v56  ;;  %4794 = vmatprep.mubr.msk.f32.mxu1 %vm5033_vm3, %v5511_v3 }
 0x47b   :  { %4769 = vmatprep.subr.mxu0 %v5511_v3  ;;  %4791 = vmatpush3.msra.mxu1 %v3272_v40  ;;  %v3759_v29 = vand.u32 4294901760, %v3758_v28 }
 0x47c   :  { %4770 = vmatpush3.msra.mxu0 %v2795_v41  ;;  %4792 = vmatprep.subr.mxu1 %v5511_v3  ;;  %v3623_v41 = vld [vmem:[#allocation5 + $0xc8] sm:$0xff] }
 0x47d   :  { %4772 = vmatmul.mubr.f32.vlgmr.msra.gmra.mxu0 %v2742_v25  ;;  %4783 = vmatprep.subr.mxu0 %v5511_v3  ;;  %v5684_v62 = vand.u32 4294901760, %v3623_v41 }
 0x47e   :  { %4787 = vmatprep.mubr.msk.f32.mxu0 %vm5033_vm3, %v5511_v3  ;;  %4784 = vmatpush3.msra.mxu0 %v5658_v20 }
 0x47f   :  { %4785 = vmatprep.subr.mxu0 %v5511_v3  ;;  %4793 = vmatpush3.msra.mxu1 %v3279_v34  ;;  %v5692_v51 = vsub.f32 %v3623_v41, %v5684_v62 }
 0x480   :  { %4786 = vmatpush3.msra.mxu0 %v5663_v31  ;;  %4804 = vmatprep.subr.mxu1 %v5511_v3 }
 0x481   :  { %4797 = vmatprep.subr.mxu0 %v5511_v3  ;;  %v3743_v1 = vand.u32 4294901760, %v5692_v51 }
 0x483   :  { %v3744_v25 = vsub.f32 %v5692_v51, %v3743_v1 }
 0x485   :  { %v3745_v55 = vand.u32 4294901760, %v3744_v25 }
 0x529   :  { %v2834_v50 = vpop.f32.mrf.mxu1 }
 0x52b   :  { %v4746_v58 = vpop.f32.mrf.mxu1 }
 0x52f   :  { %v2988_v59 = vpop.f32.mrf.mxu1 }
 0x531   :  { %v4764_v0 = vpop.f32.mrf.mxu1  ;;  %v2748_v2 = vpop.f32.mrf.mxu0 }
 0x532   :  { %v2749_v7 = vadd.f32 %v4210_v60, %v2748_v2 }
 0x533   :  { %v4737_v8 = vpop.f32.mrf.mxu0 }
 0x534   :  { %v2835_v33 = vadd.f32 %v2834_v50, %v2749_v7 }
 0x535   :  { %v3142_v37 = vpop.f32.mrf.mxu1 }
 0x537   :  { %v2912_v44 = vpop.f32.mrf.mxu0  ;;  %v4782_v52 = vpop.f32.mrf.mxu1 }
 0x538   :  { %v2913_v56 = vadd.f32 %v2912_v44, %v2835_v33  ;;  %v4212_v52 = vld [vmem:[#allocation7 + $0x7] ss:$0 sm:$0xff] }
 0x539   :  { %v4755_v63 = vpop.f32.mrf.mxu0 }
 0x53a   :  { %v2989_v39 = vadd.f32 %v2988_v59, %v2913_v56 }
 0x53d   :  { %v3068_v46 = vpop.f32.mrf.mxu0 }
 0x53e   :  { %v3069_v49 = vadd.f32 %v3068_v46, %v2989_v39 }
 0x53f   :  { %v4773_v61 = vpop.f32.mrf.mxu0 }
 0x540   :  { %v3143_v4 = vadd.f32 %v3142_v37, %v3069_v49 }
 0x542   :  { %v3146_v10 = vmax.f32 %v3143_v4, 0.0 }
 0x544   :  { %v3156_v13 = vsel %vm3154_vm9, %v3146_v10, 0 }
 0x545   :  { %v3229_v14 = vand.u32 4294901760, %v3156_v13 }
 0x547   :  { %v3230_v19 = vsub.f32 %v3156_v13, %v3229_v14  ;;  %4795 = vmatmul.mubr.f32.vlgmr.msra.gmra.mxu1 %v3229_v14 }
 0x548   :  { %4805 = vmatpush3.msra.mxu1 %v5658_v20  ;;  %4808 = vmatprep.mubr.msk.f32.mxu1 %vm5033_vm3, %v5511_v3 }
 0x549   :  { %4806 = vmatprep.subr.mxu1 %v5511_v3  ;;  %v3231_v21 = vand.u32 4294901760, %v3230_v19 }
 0x54a   :  { %4807 = vmatpush3.msra.mxu1 %v5663_v31 }
 0x54b   :  { %4818 = vmatprep.subr.mxu1 %v5511_v3  ;;  %4809 = vmatmul.mubr.f32.vlgmr.msra.gmra.mxu1 %v3231_v21  ;;  %v3232_v24 = vsub.f32 %v3230_v19, %v3231_v21 }
 0x54c   :  { %4819 = vmatpush3.msra.mxu1 %v5658_v20  ;;  %4822 = vmatprep.mubr.msk.f32.mxu1 %vm5033_vm3, %v5511_v3  ;;  %v3752_v20 = vand.u32 4294901760, %v3751_v54 }
 0x54d   :  { %4820 = vmatprep.subr.mxu1 %v5511_v3  ;;  %v3233_v27 = vand.u32 4294901760, %v3232_v24 }
 0x54e   :  { %4821 = vmatpush3.msra.mxu1 %v5663_v31  ;;  %v4211_v31 = vld [vmem:[#allocation7 + $0x6] ss:$0 sm:$0xff] }
 0x54f   :  { %4836 = vmatprep.subr.mxu1 %v5511_v3  ;;  %4788 = vmatmul.mubr.f32.vlgmr.msra.gmra.mxu0 %v3233_v27 }
 0x550   :  { %4798 = vmatpush3.msra.mxu0 %v5661_v30  ;;  %4823 = vmatmul.mubr.f32.vlgmr.msra.gmra.mxu1 %v3229_v14 }
 0x551   :  { %4837 = vmatpush3.msra.mxu1 %v3738_v11  ;;  %4799 = vmatprep.subr.mxu0 %v5511_v3 }
 0x552   :  { %4838 = vmatprep.subr.mxu1 %v5511_v3  ;;  %4800 = vmatpush3.msra.mxu0 %v5669_v15 }
 0x553   :  { %4839 = vmatpush3.msra.mxu1 %v3745_v55  ;;  %4801 = vmatprep.mubr.msk.f32.mxu0 %vm5033_vm3, %v5511_v3 }
 0x554   :  { %4811 = vmatprep.subr.mxu0 %v5511_v3  ;;  %4840 = vmatprep.subr.mxu1 %v5511_v3 }
 0x555   :  { %4802 = vmatmul.mubr.f32.vlgmr.msra.gmra.mxu0 %v3230_v19  ;;  %4841 = vmatpush3.msra.mxu1 %v3752_v20 }
 0x556   :  { %4812 = vmatpush3.msra.mxu0 %v3270_v32  ;;  %4842 = vmatprep.subr.mxu1 %v5511_v3 }
 0x557   :  { %4813 = vmatprep.subr.mxu0 %v5511_v3  ;;  %4843 = vmatpush3.msra.mxu1 %v3759_v29 }
 0x558   :  { %4814 = vmatpush3.msra.mxu0 %v3277_v38  ;;  %4844 = vmatprep.mubr.msk.f32.mxu1 %vm5033_vm3, %v5511_v3 }
 0x559   :  { %4815 = vmatprep.mubr.msk.f32.mxu0 %vm5033_vm3, %v5511_v3  ;;  %4825 = vmatprep.subr.mxu0 %v5511_v3 }
 0x55a   :  { %4845 = vmatmul.mubr.f32.vlgmr.msra.gmra.mxu1 %v5516_v43  ;;  %4858 = vmatprep.subr.mxu1 %v5511_v3 }
 0x55b   :  { %4816 = vmatmul.mubr.f32.vlgmr.msra.gmra.mxu0 %v3229_v14  ;;  %4859 = vmatpush3.msra.mxu1 %v5682_v48 }
 0x55c   :  { %4826 = vmatpush3.msra.mxu0 %v5682_v48  ;;  %4860 = vmatprep.subr.mxu1 %v5511_v3 }
 0x55d   :  { %4827 = vmatprep.subr.mxu0 %v5511_v3  ;;  %4861 = vmatpush3.msra.mxu1 %v5684_v62 }
 0x55e   :  { %4828 = vmatpush3.msra.mxu0 %v5684_v62  ;;  %4862 = vmatprep.subr.mxu1 %v5511_v3 }
 0x55f   :  { %4829 = vmatprep.subr.mxu0 %v5511_v3  ;;  %4863 = vmatpush3.msra.mxu1 %v5689_v9 }
 0x560   :  { %4830 = vmatpush3.msra.mxu0 %v5689_v9  ;;  %4864 = vmatprep.subr.mxu1 %v5511_v3 }
 0x561   :  { %4831 = vmatprep.subr.mxu0 %v5511_v3  ;;  %4833 = vmatprep.mubr.msk.f32.mxu0 %vm5033_vm3, %v5511_v3 }
 0x562   :  { %4832 = vmatpush3.msra.mxu0 %v5694_v12  ;;  %4865 = vmatpush3.msra.mxu1 %v5694_v12 }
 0x563   :  { %4866 = vmatprep.mubr.msk.f32.mxu1 %vm5033_vm3, %v5511_v3  ;;  %4834 = vmatmul.mubr.f32.vlgmr.msra.gmra.mxu0 %v5535_v53 }
 0x564   :  { %4847 = vmatprep.subr.mxu0 %v5511_v3  ;;  %4867 = vmatmul.mubr.f32.vlgmr.msra.gmra.mxu1 %v5527_v47 }
 0x565   :  { %4880 = vmatprep.subr.mxu1 %v5511_v3  ;;  %4848 = vmatpush3.msra.mxu0 %v5687_v6 }
 0x566   :  { %4881 = vmatpush3.msra.mxu1 %v5682_v48  ;;  %4849 = vmatprep.subr.mxu0 %v5511_v3 }
 0x567   :  { %4882 = vmatprep.subr.mxu1 %v5511_v3  ;;  %4850 = vmatpush3.msra.mxu0 %v5692_v51 }
 0x568   :  { %4883 = vmatpush3.msra.mxu1 %v5684_v62  ;;  %4851 = vmatprep.subr.mxu0 %v5511_v3 }
 0x569   :  { %4884 = vmatprep.subr.mxu1 %v5511_v3  ;;  %4852 = vmatpush3.msra.mxu0 %v5698_v17 }
 0x56a   :  { %4885 = vmatpush3.msra.mxu1 %v5689_v9  ;;  %4853 = vmatprep.subr.mxu0 %v5511_v3 }
 0x56b   :  { %4886 = vmatprep.subr.mxu1 %v5511_v3  ;;  %4854 = vmatpush3.msra.mxu0 %v5702_v18 }
 0x56c   :  { %4855 = vmatprep.mubr.msk.f32.mxu0 %vm5033_vm3, %v5511_v3  ;;  %4887 = vmatpush3.msra.mxu1 %v5694_v12 }
 0x56d   :  { %4888 = vmatprep.mubr.msk.f32.mxu1 %vm5033_vm3, %v5511_v3  ;;  %4856 = vmatmul.mubr.f32.vlgmr.msra.gmra.mxu0 %v5519_v45 }
 0x56e   :  { %4869 = vmatprep.subr.mxu0 %v5511_v3  ;;  %4889 = vmatmul.mubr.f32.vlgmr.msra.gmra.mxu1 %v5516_v43 }
 0x56f   :  { %4870 = vmatpush3.msra.mxu0 %v3736_v16  ;;  %4877 = vmatprep.mubr.msk.f32.mxu0 %vm5033_vm3, %v5511_v3  ;;  %vm4144_vm3 = vcmask 548184  }
 0x570   :  { %4871 = vmatprep.subr.mxu0 %v5511_v3 }
 0x571   :  { %4872 = vmatpush3.msra.mxu0 %v3743_v1 }
 0x572   :  { %4873 = vmatprep.subr.mxu0 %v5511_v3 }
 0x573   :  { %4874 = vmatpush3.msra.mxu0 %v3750_v23 }
 0x574   :  { %4875 = vmatprep.subr.mxu0 %v5511_v3 }
 0x575   :  { %4876 = vmatpush3.msra.mxu0 %v3757_v26 }
 0x576   :  { %4878 = vmatmul.mubr.f32.vlgmr.msra.gmra.mxu0 %v5516_v43 }
 0x607   :  { %v3316_v45 = vpop.f32.mrf.mxu1 }
 0x609   :  { %v4796_v47 = vpop.f32.mrf.mxu1 }
 0x60b   :  { %v3467_v53 = vpop.f32.mrf.mxu1 }
 0x60d   :  { %v4810_v30 = vpop.f32.mrf.mxu1 }
 0x60f   :  { %v3235_v32 = vpop.f32.mrf.mxu0 }
 0x610   :  { %v3236_v15 = vadd.f32 %v4211_v31, %v3235_v32  ;;  %v3617_v36 = vpop.f32.mrf.mxu1 }
 0x611   :  { %v4789_v38 = vpop.f32.mrf.mxu0 }
 0x612   :  { %v4824_v40 = vpop.f32.mrf.mxu1  ;;  %v3317_v42 = vadd.f32 %v3316_v45, %v3236_v15 }
 0x615   :  { %v3392_v34 = vpop.f32.mrf.mxu0 }
 0x616   :  { %v3393_v50 = vadd.f32 %v3392_v34, %v3317_v42 }
 0x617   :  { %v4803_v58 = vpop.f32.mrf.mxu0 }
 0x618   :  { %v3468_v3 = vadd.f32 %v3467_v53, %v3393_v50 }
 0x61a   :  { %v3796_v59 = vpop.f32.mrf.mxu1 }
 0x61b   :  { %v3544_v60 = vpop.f32.mrf.mxu0 }
 0x61c   :  { %v3545_v0 = vadd.f32 %v3544_v60, %v3468_v3  ;;  %v4846_v2 = vpop.f32.mrf.mxu1 }
 0x61d   :  { %v4817_v43 = vpop.f32.mrf.mxu0 }
 0x61e   :  { %v3618_v7 = vadd.f32 %v3617_v36, %v3545_v0 }
 0x620   :  { %4162 = vst.msk [vmem:[#allocation8] sm:$0xff] %vm652_vm15, %v3618_v7  ;;  %vm4173_vm15 = vcmask 384128  }
 0x623   :  { %v3705_v8 = vpop.f32.mrf.mxu0 }
 0x624   :  { %v3953_v33 = vpop.f32.mrf.mxu1  ;;  %v3706_v56 = vadd.f32 %v4212_v52, %v3705_v8 }
 0x625   :  { %v4835_v37 = vpop.f32.mrf.mxu0 }
 0x626   :  { %v4868_v44 = vpop.f32.mrf.mxu1  ;;  %v3797_v39 = vadd.f32 %v3796_v59, %v3706_v56 }
 0x62d   :  { %v3876_v63 = vpop.f32.mrf.mxu0 }
 0x62e   :  { %v4111_v35 = vpop.f32.mrf.mxu1  ;;  %v3877_v48 = vadd.f32 %v3876_v63, %v3797_v39 }
 0x62f   :  { %v4857_v41 = vpop.f32.mrf.mxu0 }
 0x630   :  { %v4890_v46 = vpop.f32.mrf.mxu1  ;;  %v3954_v49 = vadd.f32 %v3953_v33, %v3877_v48 }
 0x636   :  { %v4036_v57 = vpop.f32.mrf.mxu0 }
 0x637   :  { %v4037_v61 = vadd.f32 %v4036_v57, %v3954_v49 }
 0x638   :  { %v4879_v62 = vpop.f32.mrf.mxu0 }
 0x639   :  { %v4112_v4 = vadd.f32 %v4111_v35, %v4037_v61 }
 0x63b   :  { %v4145_v5 = vsel %vm4144_vm3, %v4112_v4, -inf  ;;  %v4128_v6 = vsel %vm4127_vm10, %v4112_v4, -inf  ;;  %v4116_v9 = vsel %vm4115_vm11, %v4112_v4, -inf }
 0x63c   :  { %4146 = vmax.xlane.f32.xlu0 %v4145_v5  ;;  %4129 = vmax.xlane.f32.xlu1 %v4128_v6 }
 0x640   :  { %4117 = vmax.xlane.f32.xlu1 %v4116_v9 }
 0x6c5   :  { %v4147_v10 = vpop.xlane.xlu0 %4146  ;;  %v4130_v51 = vpop.xlane.xlu1 %4129 }
 0x6c6   :  { %v4148_v12 = vsub.f32 %v4112_v4, %v4147_v10  ;;  %v4131_v13 = vsub.f32 %v4112_v4, %v4130_v51 }
 0x6c8   :  { %v4149_v14 = vmul.f32 1.442695, %v4148_v12  ;;  %v4132_v16 = vmul.f32 1.442695, %v4131_v13 }
 0x6c9   :  { %v4118_v1 = vpop.xlane.xlu1 %4117 }
 0x6ca   :  { %4922 = vpow2.f32 %v4149_v14  ;;  %v4119_v18 = vsub.f32 %v4112_v4, %v4118_v1 }
 0x6cb   :  { %4924 = vpow2.f32 %v4132_v16 }
 0x6cc   :  { %v4120_v21 = vmul.f32 1.442695, %v4119_v18 }
 0x6ce   :  { %4926 = vpow2.f32 %v4120_v21 }
 0x6d7   :  { %v4923_v17 = vpop.eup %4922 }
 0x6d8   :  { %v4925_v19 = vpop.eup %4924  ;;  %4152 = vrot.lane.b32.xlu1 %v4923_v17, %s5037_s5 }
 0x6d9   :  { %4135 = vrot.lane.b32.xlu0 %v4925_v19, %s5038_s6 }
 0x6db   :  { %v4927_v22 = vpop.eup %4926 }
 0x6dc   :  { %v4122_v23 = vsel %vm4115_vm11, %v4927_v22, 0.0 }
 0x6fc   :  { %4123 = vadd.xlane.f32.xlu1 %v4122_v23 }
 0x74a   :  { %v4153_v26 = vpop.permute.xlu1 %4152 }
 0x74b   :  { %v4136_v24 = vpop.permute.xlu0 %4135  ;;  %v4156_v27 = vsel %vm4155_vm13, %v4153_v26, 0.0 }
 0x74c   :  { %v4139_v25 = vsel %vm4138_vm12, %v4136_v24, 0.0 }
 0x74d   :  { %4140 = vadd.xlane.f32.xlu0 %v4139_v25 }
 0x751   :  { %4157 = vadd.xlane.f32.xlu0 %v4156_v27 }
 0x785   :  { %v4124_v11 = vpop.xlane.xlu1 %4123 }
 0x786   :  { %4928 = vrcp.f32 %v4124_v11 }
 0x793   :  { %v4929_v54 = vpop.eup %4928 }
 0x794   :  { %v4126_v55 = vmul.f32 %v4929_v54, %v4927_v22 }
 0x796   :  { %4164 = vrot.lane.b32.xlu1 %v4126_v55, %s5039_s7 }
 0x7d6   :  { %v4141_v28 = vpop.xlane.xlu0 %4140 }
 0x7d7   :  { %4930 = vrcp.f32 %v4141_v28 }
 0x7da   :  { %v4158_v20 = vpop.xlane.xlu0 %4157 }
 0x7db   :  { %4932 = vrcp.f32 %v4158_v20 }
 0x7e4   :  { %v4931_v29 = vpop.eup %4930 }
 0x7e5   :  { %v4143_v45 = vmul.f32 %v4931_v29, %v4925_v19 }
 0x7e7   :  { %4170 = vrot.lane.b32.xlu0 %v4143_v45, %s5039_s7 }
 0x7e8   :  { %v4933_v47 = vpop.eup %4932 }
 0x7e9   :  { %v4160_v53 = vmul.f32 %v4933_v47, %v4923_v17 }
 0x7eb   :  { %4176 = vrot.lane.b32.xlu1 %v4160_v53, %s5039_s7 }
 0x808   :  { %v4165_v30 = vpop.permute.xlu1 %4164 }
 0x809   :  { %4168 = vst.msk [vmem:[#allocation8] sm:$0xff] %vm4167_vm14, %v4165_v30 }
 0x859   :  { %v4171_v31 = vpop.permute.xlu0 %4170 }
 0x85a   :  { %4174 = vst.msk [vmem:[#allocation8] sm:$0xff] %vm4173_vm15, %v4171_v31 }
 0x85d   :  { %v4177_v32 = vpop.permute.xlu1 %4176 }
 0x85e   :  { %4180 = vst.msk [vmem:[#allocation8] sm:$0xff] %vm4179_vm0, %v4177_v32 }
 0x85f   :  { %5006 = shalt.err (!%p5003_p5)
}
 0x860   :  { %4190 = dma.vmem_to_hbm [thread:$0]  %s4188_s9, 128, %s5817_s3, [#allocation4]  }
 0x861   :  { %5019 = dma.done.wait [#allocation4], 128  }
 0x862   :  { %5020 = vsyncadd [#allocation4], 4294967168 }
 0x863   :  { %4194 = vsyncpa [#allocation3], 1 }
 0x864   :  { %4195 = vsyncpa [#allocation6], 1 }
 0x865   :  { %4196 = vsyncpa [#allocation4], 1 }

</bundles_post_ra>
